<compile_context>
chip_gen: v7x
topology: tpu7x:2x2x1
jax: 0.10.0
libtpu: 0.0.40
codegen_flags: <defaults>
</compile_context>

<pallas_src>
import math
import functools

import jax
import jax.numpy as jnp
from jax import lax
from jax.experimental import pallas as pl
from jax.experimental.pallas import tpu as pltpu


def encode_block_kernel(x_ref,
                        wqkv_ref, bqkv_ref,
                        wp_ref, bp_ref,
                        g1_ref, be1_ref,
                        w1_ref, b1_ref, w2_ref, b2_ref,
                        g2_ref, be2_ref,
                        o_ref,
                        *, n_head, mxu_dtype):
    TB, L, D = x_ref.shape
    H = n_head
    dh = D // H
    md = mxu_dtype
    exact = jnp.dtype(md) == jnp.dtype(jnp.float32)
    scale = 1.0 / math.sqrt(dh)

    x = x_ref[...].astype(jnp.float32)              # (TB, L, D)
    xf = x.reshape(TB * L, D)                       # flatten batch*seq -> fat MXU M dim
    xm = xf.astype(md)

    # ---- fused QKV projection: one (TB*L, D) @ (D, 3D) MXU pass ----
    qkv = jnp.dot(xm, wqkv_ref[...], preferred_element_type=jnp.float32)
    qkv = qkv + bqkv_ref[...]
    # fold 1/sqrt(dh) into q once (cheaper than scaling every (L, L) score tile)
    q = (qkv[:, 0 * D:1 * D] * scale).reshape(TB, L, D).astype(md)
    k = qkv[:, 1 * D:2 * D].reshape(TB, L, D).astype(md)
    v = qkv[:, 2 * D:3 * D].reshape(TB, L, D).astype(md)

    # ---- multi-head attention (unmasked), batched over TB sequences per head ----
    # Per-head single-batch-dim einsums (known-good Mosaic lowering); head contexts
    # are merged along the lane dim and pushed through ONE full K=D output
    # projection matmul (fills the 256-deep MXU on v6e/v7x; for dh % 128 == 0 the
    # concat is pure layout).
    # TODO(synk): a fully batched 'blhd,bmhd->bhlm' formulation would remove the
    # static H loop, but multi-batch-dim dot_general lowering is not relied on here.
    ctx = []
    for h in range(H):                              # static, H is small
        sl = slice(h * dh, (h + 1) * dh)
        att = jnp.einsum('bld,bmd->blm', q[:, :, sl], k[:, :, sl],
                         preferred_element_type=jnp.float32)       # (TB, L, L)
        att = att - jnp.max(att, axis=-1, keepdims=True)
        p = jnp.exp(att)
        denom = jnp.sum(p, axis=-1, keepdims=True)
        if exact:
            p = p / denom                            # exact path: no approximation
        else:
            # EUP approx reciprocal instead of a VALU divide (fast bf16 path only)
            p = p * pl.reciprocal(denom, approx=True)
        yh = jnp.einsum('blm,bmd->bld', p.astype(md), v[:, :, sl],
                        preferred_element_type=jnp.float32)        # (TB, L, dh)
        ctx.append(yh)
    y_ctx = jnp.concatenate(ctx, axis=-1).reshape(TB * L, D)        # (TB*L, D)
    y = jnp.dot(y_ctx.astype(md), wp_ref[...],
                preferred_element_type=jnp.float32) + bp_ref[...]

    # ---- residual + LayerNorm 1 (eps=1e-5), all f32 ----
    x1 = xf + y
    mu1 = jnp.mean(x1, axis=-1, keepdims=True)
    xc1 = x1 - mu1
    var1 = jnp.mean(xc1 * xc1, axis=-1, keepdims=True)
    x1n = xc1 * lax.rsqrt(var1 + 1e-5) * g1_ref[...] + be1_ref[...]

    # ---- MLP: Linear -> GELU(exact erf, matches nn.GELU default) -> Linear ----
    hdn = jnp.dot(x1n.astype(md), w1_ref[...],
                  preferred_element_type=jnp.float32) + b1_ref[...]
    hdn = 0.5 * hdn * (1.0 + lax.erf(hdn * (1.0 / math.sqrt(2.0))))
    m = jnp.dot(hdn.astype(md), w2_ref[...],
                preferred_element_type=jnp.float32) + b2_ref[...]

    # ---- residual + LayerNorm 2 ----
    x2 = x1n + m
    mu2 = jnp.mean(x2, axis=-1, keepdims=True)
    xc2 = x2 - mu2
    var2 = jnp.mean(xc2 * xc2, axis=-1, keepdims=True)
    x2n = xc2 * lax.rsqrt(var2 + 1e-5) * g2_ref[...] + be2_ref[...]

    # For production D % 128 == 0 this store is lane-dense; for tiny D (< 128) the
    # last dim equals the full array dim so the (8,128) rule is still satisfied.
    o_ref[...] = x2n.reshape(TB, L, D).astype(o_ref.dtype)


def _vmem_capacity_bytes():
    """Per-core VMEM capacity; conservative 64 MiB (v7x-like) if the query fails."""
    try:
        cap = getattr(pltpu.get_tpu_info(), "vmem_capacity_bytes", None)
        if cap:
            return int(cap)
    except Exception:  # query helper only; never affects kernel semantics
        pass
    return 64 * 1024 * 1024


def _pick_batch_tile(B, L, vmem_capacity):
    """Largest divisor TB of B with TB*L <= target rows, keeping >= 2 grid steps
    whenever B >= 2 (so both v7x TensorCores get work)."""
    # 128-MiB chips (v5e/v6e): fatter 768-row slabs amortize per-step overhead and
    # weight pushes; 64-MiB v7x: ~256 rows.
    target_rows = 768 if vmem_capacity >= (96 << 20) else 256
    best = 1
    for cand in range(1, B + 1):
        if B % cand:
            continue
        if cand * L > target_rows:
            continue
        if B >= 2 and B // cand < 2:
            continue
        best = cand
    return best


def prepare_encode_block_params(params, mxu_dtype=jnp.bfloat16):
    """One-time weight prep (hoisted out of the forward): fuse Q/K/V into a single
    (D, 3D) weight / (1, 3D) bias (order q, k, v) and cast matmul weights to the
    MXU input dtype.  Biases and LayerNorm params stay f32."""
    (wk, bk, wq, bq, wv, bv, wp, bp, g1, be1, w1, b1, w2, b2, g2, be2) = params
    f32 = jnp.float32
    wqkv = jnp.concatenate([wq, wk, wv], axis=1).astype(mxu_dtype)
    bqkv = jnp.concatenate([bq, bk, bv], axis=1).astype(f32)
    return (wqkv, bqkv,
            wp.astype(mxu_dtype), bp.astype(f32),
            g1.astype(f32), be1.astype(f32),
            w1.astype(mxu_dtype), b1.astype(f32),
            w2.astype(mxu_dtype), b2.astype(f32),
            g2.astype(f32), be2.astype(f32))


def encode_block_fused(x, fused_params, n_head, *, mxu_dtype=jnp.bfloat16,
                       batch_tile=None, single_buffer_weights=None):
    B, L, D = x.shape
    (wqkv, bqkv, wp, bp, g1, be1, w1, b1, w2, b2, g2, be2) = fused_params

    vmem_cap = _vmem_capacity_bytes()
    TB = batch_tile if batch_tile is not None else _pick_batch_tile(B, L, vmem_cap)
    assert B % TB == 0, (B, TB)
    grid = (B // TB,)

    w_item = jnp.dtype(mxu_dtype).itemsize
    weight_bytes = (wqkv.size + wp.size + w1.size + w2.size) * w_item
    small_bytes = (bqkv.size + bp.size + g1.size + be1.size + b1.size + b2.size
                   + g2.size + be2.size) * 4
    act_bytes = 2 * 2 * TB * L * D * x.dtype.itemsize     # x/o blocks, double-buffered
    scratch_bytes = 16 * TB * L * D * 4                    # generous intermediates estimate
    est = 2 * weight_bytes + 2 * small_bytes + act_bytes + scratch_bytes
    # Cap at ~80% of physical per-core VMEM (leaves headroom for compiler scratch /
    # semaphores; v7x only has 64 MiB per TensorCore).
    vmem_limit = int(max(8 << 20, min(int(0.8 * vmem_cap), 2 * est)))

    cost = pl.CostEstimate(
        flops=int(2 * B * L * (6 * D * D + 2 * L * D)),
        transcendentals=int(B * L * (D + n_head * L)),
        bytes_accessed=int(weight_bytes + small_bytes + 2 * B * L * D * x.dtype.itemsize),
    )

    def build(weight_mode):
        def wspec(shape):
            if weight_mode is None:
                return pl.BlockSpec(shape, lambda b: (0, 0))
            return pl.BlockSpec(shape, lambda b: (0, 0), pipeline_mode=weight_mode)

        in_specs = [
            pl.BlockSpec((TB, L, D), lambda b: (b, 0, 0)),     # x
            wspec((D, 3 * D)), wspec((1, 3 * D)),              # fused qkv
            wspec((D, D)), wspec((1, D)),                      # proj
            wspec((1, D)), wspec((1, D)),                      # ln1 gamma/beta
            wspec((D, D)), wspec((1, D)),                      # mlp fc1
            wspec((D, D)), wspec((1, D)),                      # mlp fc2
            wspec((1, D)), wspec((1, D)),                      # ln2 gamma/beta
        ]
        return pl.pallas_call(
            functools.partial(encode_block_kernel, n_head=n_head, mxu_dtype=mxu_dtype),
            out_shape=jax.ShapeDtypeStruct((B, L, D), x.dtype),
            grid=grid,
            in_specs=in_specs,
            out_specs=pl.BlockSpec((TB, L, D), lambda b: (b, 0, 0)),
            compiler_params=pltpu.CompilerParams(
                dimension_semantics=("parallel",),
                vmem_limit_bytes=vmem_limit),
            cost_estimate=cost,
        )

    args = (x, wqkv, bqkv, wp, bp, g1, be1, w1, b1, w2, b2, g2, be2)

    # Grid-invariant weights only need one VMEM buffer.  Only bother (and only risk
    # the pipeline_mode feature) when the double-buffered weight footprint is a
    # meaningful slice of the VMEM budget (large D, esp. v7x's 64 MiB).
    if single_buffer_weights is None:
        single_buffer_weights = (2 * weight_bytes) * 4 > vmem_limit
    if single_buffer_weights:
        try:
            return build(pl.Buffered(buffer_count=1))(*args)
        except (pltpu.LoweringException, NotImplementedError, TypeError, ValueError):
            # Narrow fallback: only "single-buffering not supported here" style
            # construction/lowering errors; genuine runtime failures (e.g. VMEM OOM)
            # propagate instead of silently doubling the weight footprint.
            pass
    return build(None)(*args)


def encode_block(x, params, n_head, *, mxu_dtype=jnp.bfloat16, batch_tile=None):
    """Convenience wrapper: prepare weights then run the fused kernel.  For real use,
    call prepare_encode_block_params() once and reuse the result across forwards."""
    fused = prepare_encode_block_params(params, mxu_dtype)
    return encode_block_fused(x, fused, n_head, mxu_dtype=mxu_dtype, batch_tile=batch_tile)


def reference_encode_block(x, params, n_head):
    """Pure-JAX reference mirroring the PyTorch forward."""
    (wk, bk, wq, bq, wv, bv, wp, bp, g1, be1, w1, b1, w2, b2, g2, be2) = params
    B, L, D = x.shape
    dh = D // n_head

    def ln(z, g, b):
        mu = jnp.mean(z, axis=-1, keepdims=True)
        var = jnp.mean((z - mu) ** 2, axis=-1, keepdims=True)
        return (z - mu) / jnp.sqrt(var + 1e-5) * g + b

    k = (x @ wk + bk).reshape(B, L, n_head, dh).transpose(0, 2, 1, 3)
    q = (x @ wq + bq).reshape(B, L, n_head, dh).transpose(0, 2, 1, 3)
    v = (x @ wv + bv).reshape(B, L, n_head, dh).transpose(0, 2, 1, 3)
    att = (q @ k.transpose(0, 1, 3, 2)) * (1.0 / math.sqrt(dh))
    att = jax.nn.softmax(att, axis=-1)
    y = (att @ v).transpose(0, 2, 1, 3).reshape(B, L, D)
    y = y @ wp + bp
    x1 = ln(x + y, g1, be1)
    h = x1 @ w1 + b1
    h = 0.5 * h * (1.0 + lax.erf(h / math.sqrt(2.0)))
    m = h @ w2 + b2
    return ln(x1 + m, g2, be2)


def make_params(key, D):
    ks = jax.random.split(key, 8)
    # Deterministic synthetic init (orthogonal-flavored via QR) — not a checkpoint load.
    def ortho(k, scale):
        a = jax.random.normal(k, (D, D), jnp.float32)
        qm, _ = jnp.linalg.qr(a)
        return (qm * scale).astype(jnp.float32)

    wk = ortho(ks[0], 0.01); wq = ortho(ks[1], 0.01)
    wv = ortho(ks[2], 0.01); wp = ortho(ks[3], 0.01)
    w1 = ortho(ks[4], math.sqrt(2.0))   # activate=True -> relu-ish gain
    w2 = ortho(ks[5], 0.01)
    zb = jnp.zeros((1, D), jnp.float32)
    ones = jnp.ones((1, D), jnp.float32)
    return (wk, zb, wq, zb, wv, zb, wp, zb,     # qkv + proj (bias init = 0)
            ones, zb,                           # ln1 gamma=1, beta=0
            w1, zb, w2, zb,                     # mlp
            ones, zb)                           # ln2


if __name__ == "__main__":
    B, L, D, H = 8, 8, 32, 4   # batch=B, n_agent=L, n_embd=D, n_head=H
    key = jax.random.PRNGKey(0)
    kx, kp = jax.random.split(key)
    x = jax.random.normal(kx, (B, L, D), jnp.float32)
    params = make_params(kp, D)

    ref = reference_encode_block(x, params, H)

    # Exact path (f32 MXU inputs, exact softmax reciprocal) — tight tolerance.
    fused_f32 = prepare_encode_block_params(params, jnp.float32)
    out_f32 = jax.block_until_ready(
        encode_block_fused(x, fused_f32, H, mxu_dtype=jnp.float32))
    assert out_f32.shape == (B, L, D)
    assert jnp.allclose(out_f32, ref, atol=1e-3, rtol=1e-3), \
        float(jnp.max(jnp.abs(out_f32 - ref)))

    # Fast path (bf16 MXU inputs, f32 accumulation, approx reciprocal) — bf16 tolerance.
    fused_bf16 = prepare_encode_block_params(params, jnp.bfloat16)
    out_bf16 = jax.block_until_ready(
        encode_block_fused(x, fused_bf16, H, mxu_dtype=jnp.bfloat16))
    assert out_bf16.shape == (B, L, D)
    assert jnp.allclose(out_bf16, ref, atol=3e-2, rtol=3e-2), \
        float(jnp.max(jnp.abs(out_bf16 - ref)))

    print("KERNEL_OK")
</pallas_src>

<mosaic_0001>
module attributes {stable_mosaic.version = 11 : i64} {
  func.func @encode_block_kernel(%arg0: i32, %arg1: memref<4x8x32xf32, #tpu.memory_space<vmem>>, %arg2: memref<32x96xf32, #tpu.memory_space<vmem>>, %arg3: memref<1x96xf32, #tpu.memory_space<vmem>>, %arg4: memref<32x32xf32, #tpu.memory_space<vmem>>, %arg5: memref<1x32xf32, #tpu.memory_space<vmem>>, %arg6: memref<1x32xf32, #tpu.memory_space<vmem>>, %arg7: memref<1x32xf32, #tpu.memory_space<vmem>>, %arg8: memref<32x32xf32, #tpu.memory_space<vmem>>, %arg9: memref<1x32xf32, #tpu.memory_space<vmem>>, %arg10: memref<32x32xf32, #tpu.memory_space<vmem>>, %arg11: memref<1x32xf32, #tpu.memory_space<vmem>>, %arg12: memref<1x32xf32, #tpu.memory_space<vmem>>, %arg13: memref<1x32xf32, #tpu.memory_space<vmem>>, %arg14: memref<4x8x32xf32, #tpu.memory_space<vmem>>) attributes {dimension_semantics = [#tpu.dimension_semantics<parallel>], iteration_bounds = array<i64: 2>, scalar_prefetch = 0 : i64, scratch_operands = 0 : i64, tpu.core_type = #tpu.core_type<tc>, window_params = [{transform_indices = @transform_0, window_bounds = array<i64: 4, 8, 32>}, {pipeline_mode = #tpu.pipeline_mode<synchronous>, transform_indices = @transform_1, window_bounds = array<i64: 32, 96>}, {pipeline_mode = #tpu.pipeline_mode<synchronous>, transform_indices = @transform_2, window_bounds = array<i64: 1, 96>}, {pipeline_mode = #tpu.pipeline_mode<synchronous>, transform_indices = @transform_3, window_bounds = array<i64: 32, 32>}, {pipeline_mode = #tpu.pipeline_mode<synchronous>, transform_indices = @transform_4, window_bounds = array<i64: 1, 32>}, {pipeline_mode = #tpu.pipeline_mode<synchronous>, transform_indices = @transform_5, window_bounds = array<i64: 1, 32>}, {pipeline_mode = #tpu.pipeline_mode<synchronous>, transform_indices = @transform_6, window_bounds = array<i64: 1, 32>}, {pipeline_mode = #tpu.pipeline_mode<synchronous>, transform_indices = @transform_7, window_bounds = array<i64: 32, 32>}, {pipeline_mode = #tpu.pipeline_mode<synchronous>, transform_indices = @transform_8, window_bounds = array<i64: 1, 32>}, {pipeline_mode = #tpu.pipeline_mode<synchronous>, transform_indices = @transform_9, window_bounds = array<i64: 32, 32>}, {pipeline_mode = #tpu.pipeline_mode<synchronous>, transform_indices = @transform_10, window_bounds = array<i64: 1, 32>}, {pipeline_mode = #tpu.pipeline_mode<synchronous>, transform_indices = @transform_11, window_bounds = array<i64: 1, 32>}, {pipeline_mode = #tpu.pipeline_mode<synchronous>, transform_indices = @transform_12, window_bounds = array<i64: 1, 32>}, {transform_indices = @transform_13, window_bounds = array<i64: 4, 8, 32>}]} {
    %c0 = arith.constant 0 : index
    %c0_0 = arith.constant 0 : index
    %c0_1 = arith.constant 0 : index
    %0 = vector.load %arg1[%c0, %c0_0, %c0_1] : memref<4x8x32xf32, #tpu.memory_space<vmem>>, vector<4x8x32xf32>
    %1 = vector.shape_cast %0 : vector<4x8x32xf32> to vector<32x32xf32>
    %c0_2 = arith.constant 0 : index
    %c0_3 = arith.constant 0 : index
    %2 = vector.load %arg2[%c0_2, %c0_3] : memref<32x96xf32, #tpu.memory_space<vmem>>, vector<32x96xf32>
    %cst = arith.constant dense<0.000000e+00> : vector<32x96xf32>
    %3 = tpu.matmul %1, %2, %cst {dimension_numbers = #tpu.dot_dimension_numbers<[1], [0], [0], [1], [0, 0, 1, 1], [], []>} : vector<32x32xf32>, vector<32x96xf32>, vector<32x96xf32> -> vector<32x96xf32>
    %c0_4 = arith.constant 0 : index
    %c0_5 = arith.constant 0 : index
    %4 = vector.load %arg3[%c0_4, %c0_5] : memref<1x96xf32, #tpu.memory_space<vmem>>, vector<1x96xf32>
    %5 = vector.broadcast %4 : vector<1x96xf32> to vector<32x96xf32>
    %6 = arith.addf %3, %5 : vector<32x96xf32>
    %7 = vector.extract_strided_slice %6 {offsets = [0, 0], sizes = [32, 32], strides = [1, 1]} : vector<32x96xf32> to vector<32x32xf32>
    %cst_6 = arith.constant 0.353553385 : f32
    %8 = vector.broadcast %cst_6 : f32 to vector<32x32xf32>
    %9 = arith.mulf %7, %8 : vector<32x32xf32>
    %10 = vector.shape_cast %9 : vector<32x32xf32> to vector<4x8x32xf32>
    %11 = vector.extract_strided_slice %6 {offsets = [0, 32], sizes = [32, 32], strides = [1, 1]} : vector<32x96xf32> to vector<32x32xf32>
    %12 = vector.shape_cast %11 : vector<32x32xf32> to vector<4x8x32xf32>
    %13 = vector.extract_strided_slice %6 {offsets = [0, 64], sizes = [32, 32], strides = [1, 1]} : vector<32x96xf32> to vector<32x32xf32>
    %14 = vector.shape_cast %13 : vector<32x32xf32> to vector<4x8x32xf32>
    %15 = vector.extract_strided_slice %10 {offsets = [0, 0, 0], sizes = [4, 8, 8], strides = [1, 1, 1]} : vector<4x8x32xf32> to vector<4x8x8xf32>
    %16 = vector.extract_strided_slice %12 {offsets = [0, 0, 0], sizes = [4, 8, 8], strides = [1, 1, 1]} : vector<4x8x32xf32> to vector<4x8x8xf32>
    "tpu.trace_start"() <{level = 10 : i32, message = "bld,bmd->blm"}> : () -> ()
    %cst_7 = arith.constant dense<0.000000e+00> : vector<4x8x8xf32>
    %17 = tpu.matmul %15, %16, %cst_7 {dimension_numbers = #tpu.dot_dimension_numbers<[2], [2], [1], [1], [0, 0, 0, 1, 1, 1], [0], [0]>} : vector<4x8x8xf32>, vector<4x8x8xf32>, vector<4x8x8xf32> -> vector<4x8x8xf32>
    "tpu.trace_stop"() : () -> ()
    %cst_8 = arith.constant dense<0xFF800000> : vector<4x8xf32>
    %18 = vector.multi_reduction <maximumf>, %17, %cst_8 [2] : vector<4x8x8xf32> to vector<4x8xf32>
    %19 = vector.shape_cast %18 : vector<4x8xf32> to vector<4x8x1xf32>
    %20 = vector.broadcast %19 : vector<4x8x1xf32> to vector<4x8x8xf32>
    %21 = arith.subf %17, %20 : vector<4x8x8xf32>
    %22 = math.exp %21 : vector<4x8x8xf32>
    %cst_9 = arith.constant dense<0.000000e+00> : vector<4x8xf32>
    %23 = vector.multi_reduction <add>, %22, %cst_9 [2] : vector<4x8x8xf32> to vector<4x8xf32>
    %24 = vector.shape_cast %23 : vector<4x8xf32> to vector<4x8x1xf32>
    %25 = vector.broadcast %24 : vector<4x8x1xf32> to vector<4x8x8xf32>
    %26 = arith.divf %22, %25 : vector<4x8x8xf32>
    %27 = vector.extract_strided_slice %14 {offsets = [0, 0, 0], sizes = [4, 8, 8], strides = [1, 1, 1]} : vector<4x8x32xf32> to vector<4x8x8xf32>
    "tpu.trace_start"() <{level = 10 : i32, message = "blm,bmd->bld"}> : () -> ()
    %cst_10 = arith.constant dense<0.000000e+00> : vector<4x8x8xf32>
    %28 = tpu.matmul %26, %27, %cst_10 {dimension_numbers = #tpu.dot_dimension_numbers<[2], [1], [1], [2], [0, 0, 0, 1, 1, 2], [0], [0]>} : vector<4x8x8xf32>, vector<4x8x8xf32>, vector<4x8x8xf32> -> vector<4x8x8xf32>
    "tpu.trace_stop"() : () -> ()
    %29 = vector.extract_strided_slice %10 {offsets = [0, 0, 8], sizes = [4, 8, 8], strides = [1, 1, 1]} : vector<4x8x32xf32> to vector<4x8x8xf32>
    %30 = vector.extract_strided_slice %12 {offsets = [0, 0, 8], sizes = [4, 8, 8], strides = [1, 1, 1]} : vector<4x8x32xf32> to vector<4x8x8xf32>
    "tpu.trace_start"() <{level = 10 : i32, message = "bld,bmd->blm"}> : () -> ()
    %cst_11 = arith.constant dense<0.000000e+00> : vector<4x8x8xf32>
    %31 = tpu.matmul %29, %30, %cst_11 {dimension_numbers = #tpu.dot_dimension_numbers<[2], [2], [1], [1], [0, 0, 0, 1, 1, 1], [0], [0]>} : vector<4x8x8xf32>, vector<4x8x8xf32>, vector<4x8x8xf32> -> vector<4x8x8xf32>
    "tpu.trace_stop"() : () -> ()
    %cst_12 = arith.constant dense<0xFF800000> : vector<4x8xf32>
    %32 = vector.multi_reduction <maximumf>, %31, %cst_12 [2] : vector<4x8x8xf32> to vector<4x8xf32>
    %33 = vector.shape_cast %32 : vector<4x8xf32> to vector<4x8x1xf32>
    %34 = vector.broadcast %33 : vector<4x8x1xf32> to vector<4x8x8xf32>
    %35 = arith.subf %31, %34 : vector<4x8x8xf32>
    %36 = math.exp %35 : vector<4x8x8xf32>
    %cst_13 = arith.constant dense<0.000000e+00> : vector<4x8xf32>
    %37 = vector.multi_reduction <add>, %36, %cst_13 [2] : vector<4x8x8xf32> to vector<4x8xf32>
    %38 = vector.shape_cast %37 : vector<4x8xf32> to vector<4x8x1xf32>
    %39 = vector.broadcast %38 : vector<4x8x1xf32> to vector<4x8x8xf32>
    %40 = arith.divf %36, %39 : vector<4x8x8xf32>
    %41 = vector.extract_strided_slice %14 {offsets = [0, 0, 8], sizes = [4, 8, 8], strides = [1, 1, 1]} : vector<4x8x32xf32> to vector<4x8x8xf32>
    "tpu.trace_start"() <{level = 10 : i32, message = "blm,bmd->bld"}> : () -> ()
    %cst_14 = arith.constant dense<0.000000e+00> : vector<4x8x8xf32>
    %42 = tpu.matmul %40, %41, %cst_14 {dimension_numbers = #tpu.dot_dimension_numbers<[2], [1], [1], [2], [0, 0, 0, 1, 1, 2], [0], [0]>} : vector<4x8x8xf32>, vector<4x8x8xf32>, vector<4x8x8xf32> -> vector<4x8x8xf32>
    "tpu.trace_stop"() : () -> ()
    %43 = vector.extract_strided_slice %10 {offsets = [0, 0, 16], sizes = [4, 8, 8], strides = [1, 1, 1]} : vector<4x8x32xf32> to vector<4x8x8xf32>
    %44 = vector.extract_strided_slice %12 {offsets = [0, 0, 16], sizes = [4, 8, 8], strides = [1, 1, 1]} : vector<4x8x32xf32> to vector<4x8x8xf32>
    "tpu.trace_start"() <{level = 10 : i32, message = "bld,bmd->blm"}> : () -> ()
    %cst_15 = arith.constant dense<0.000000e+00> : vector<4x8x8xf32>
    %45 = tpu.matmul %43, %44, %cst_15 {dimension_numbers = #tpu.dot_dimension_numbers<[2], [2], [1], [1], [0, 0, 0, 1, 1, 1], [0], [0]>} : vector<4x8x8xf32>, vector<4x8x8xf32>, vector<4x8x8xf32> -> vector<4x8x8xf32>
    "tpu.trace_stop"() : () -> ()
    %cst_16 = arith.constant dense<0xFF800000> : vector<4x8xf32>
    %46 = vector.multi_reduction <maximumf>, %45, %cst_16 [2] : vector<4x8x8xf32> to vector<4x8xf32>
    %47 = vector.shape_cast %46 : vector<4x8xf32> to vector<4x8x1xf32>
    %48 = vector.broadcast %47 : vector<4x8x1xf32> to vector<4x8x8xf32>
    %49 = arith.subf %45, %48 : vector<4x8x8xf32>
    %50 = math.exp %49 : vector<4x8x8xf32>
    %cst_17 = arith.constant dense<0.000000e+00> : vector<4x8xf32>
    %51 = vector.multi_reduction <add>, %50, %cst_17 [2] : vector<4x8x8xf32> to vector<4x8xf32>
    %52 = vector.shape_cast %51 : vector<4x8xf32> to vector<4x8x1xf32>
    %53 = vector.broadcast %52 : vector<4x8x1xf32> to vector<4x8x8xf32>
    %54 = arith.divf %50, %53 : vector<4x8x8xf32>
    %55 = vector.extract_strided_slice %14 {offsets = [0, 0, 16], sizes = [4, 8, 8], strides = [1, 1, 1]} : vector<4x8x32xf32> to vector<4x8x8xf32>
    "tpu.trace_start"() <{level = 10 : i32, message = "blm,bmd->bld"}> : () -> ()
    %cst_18 = arith.constant dense<0.000000e+00> : vector<4x8x8xf32>
    %56 = tpu.matmul %54, %55, %cst_18 {dimension_numbers = #tpu.dot_dimension_numbers<[2], [1], [1], [2], [0, 0, 0, 1, 1, 2], [0], [0]>} : vector<4x8x8xf32>, vector<4x8x8xf32>, vector<4x8x8xf32> -> vector<4x8x8xf32>
    "tpu.trace_stop"() : () -> ()
    %57 = vector.extract_strided_slice %10 {offsets = [0, 0, 24], sizes = [4, 8, 8], strides = [1, 1, 1]} : vector<4x8x32xf32> to vector<4x8x8xf32>
    %58 = vector.extract_strided_slice %12 {offsets = [0, 0, 24], sizes = [4, 8, 8], strides = [1, 1, 1]} : vector<4x8x32xf32> to vector<4x8x8xf32>
    "tpu.trace_start"() <{level = 10 : i32, message = "bld,bmd->blm"}> : () -> ()
    %cst_19 = arith.constant dense<0.000000e+00> : vector<4x8x8xf32>
    %59 = tpu.matmul %57, %58, %cst_19 {dimension_numbers = #tpu.dot_dimension_numbers<[2], [2], [1], [1], [0, 0, 0, 1, 1, 1], [0], [0]>} : vector<4x8x8xf32>, vector<4x8x8xf32>, vector<4x8x8xf32> -> vector<4x8x8xf32>
    "tpu.trace_stop"() : () -> ()
    %cst_20 = arith.constant dense<0xFF800000> : vector<4x8xf32>
    %60 = vector.multi_reduction <maximumf>, %59, %cst_20 [2] : vector<4x8x8xf32> to vector<4x8xf32>
    %61 = vector.shape_cast %60 : vector<4x8xf32> to vector<4x8x1xf32>
    %62 = vector.broadcast %61 : vector<4x8x1xf32> to vector<4x8x8xf32>
    %63 = arith.subf %59, %62 : vector<4x8x8xf32>
    %64 = math.exp %63 : vector<4x8x8xf32>
    %cst_21 = arith.constant dense<0.000000e+00> : vector<4x8xf32>
    %65 = vector.multi_reduction <add>, %64, %cst_21 [2] : vector<4x8x8xf32> to vector<4x8xf32>
    %66 = vector.shape_cast %65 : vector<4x8xf32> to vector<4x8x1xf32>
    %67 = vector.broadcast %66 : vector<4x8x1xf32> to vector<4x8x8xf32>
    %68 = arith.divf %64, %67 : vector<4x8x8xf32>
    %69 = vector.extract_strided_slice %14 {offsets = [0, 0, 24], sizes = [4, 8, 8], strides = [1, 1, 1]} : vector<4x8x32xf32> to vector<4x8x8xf32>
    "tpu.trace_start"() <{level = 10 : i32, message = "blm,bmd->bld"}> : () -> ()
    %cst_22 = arith.constant dense<0.000000e+00> : vector<4x8x8xf32>
    %70 = tpu.matmul %68, %69, %cst_22 {dimension_numbers = #tpu.dot_dimension_numbers<[2], [1], [1], [2], [0, 0, 0, 1, 1, 2], [0], [0]>} : vector<4x8x8xf32>, vector<4x8x8xf32>, vector<4x8x8xf32> -> vector<4x8x8xf32>
    "tpu.trace_stop"() : () -> ()
    %71 = tpu.concatenate %28, %42, %56, %70 in 2 : vector<4x8x8xf32>, vector<4x8x8xf32>, vector<4x8x8xf32>, vector<4x8x8xf32> -> vector<4x8x32xf32>
    %72 = vector.shape_cast %71 : vector<4x8x32xf32> to vector<32x32xf32>
    %c0_23 = arith.constant 0 : index
    %c0_24 = arith.constant 0 : index
    %73 = vector.load %arg4[%c0_23, %c0_24] : memref<32x32xf32, #tpu.memory_space<vmem>>, vector<32x32xf32>
    %cst_25 = arith.constant dense<0.000000e+00> : vector<32x32xf32>
    %74 = tpu.matmul %72, %73, %cst_25 {dimension_numbers = #tpu.dot_dimension_numbers<[1], [0], [0], [1], [0, 0, 1, 1], [], []>} : vector<32x32xf32>, vector<32x32xf32>, vector<32x32xf32> -> vector<32x32xf32>
    %c0_26 = arith.constant 0 : index
    %c0_27 = arith.constant 0 : index
    %75 = vector.load %arg5[%c0_26, %c0_27] : memref<1x32xf32, #tpu.memory_space<vmem>>, vector<1x32xf32>
    %76 = vector.broadcast %75 : vector<1x32xf32> to vector<32x32xf32>
    %77 = arith.addf %74, %76 : vector<32x32xf32>
    %78 = arith.addf %1, %77 : vector<32x32xf32>
    %cst_28 = arith.constant dense<0.000000e+00> : vector<32xf32>
    %79 = vector.multi_reduction <add>, %78, %cst_28 [1] : vector<32x32xf32> to vector<32xf32>
    %80 = vector.shape_cast %79 : vector<32xf32> to vector<32x1xf32>
    %cst_29 = arith.constant 3.200000e+01 : f32
    %81 = vector.broadcast %cst_29 : f32 to vector<32x1xf32>
    %82 = arith.divf %80, %81 : vector<32x1xf32>
    %83 = vector.broadcast %82 : vector<32x1xf32> to vector<32x32xf32>
    %84 = arith.subf %78, %83 : vector<32x32xf32>
    %85 = arith.mulf %84, %84 : vector<32x32xf32>
    %cst_30 = arith.constant dense<0.000000e+00> : vector<32xf32>
    %86 = vector.multi_reduction <add>, %85, %cst_30 [1] : vector<32x32xf32> to vector<32xf32>
    %87 = vector.shape_cast %86 : vector<32xf32> to vector<32x1xf32>
    %cst_31 = arith.constant 3.200000e+01 : f32
    %88 = vector.broadcast %cst_31 : f32 to vector<32x1xf32>
    %89 = arith.divf %87, %88 : vector<32x1xf32>
    %cst_32 = arith.constant 9.99999974E-6 : f32
    %90 = vector.broadcast %cst_32 : f32 to vector<32x1xf32>
    %91 = arith.addf %89, %90 : vector<32x1xf32>
    %92 = math.rsqrt %91 : vector<32x1xf32>
    %93 = vector.broadcast %92 : vector<32x1xf32> to vector<32x32xf32>
    %94 = arith.mulf %84, %93 : vector<32x32xf32>
    %c0_33 = arith.constant 0 : index
    %c0_34 = arith.constant 0 : index
    %95 = vector.load %arg6[%c0_33, %c0_34] : memref<1x32xf32, #tpu.memory_space<vmem>>, vector<1x32xf32>
    %96 = vector.broadcast %95 : vector<1x32xf32> to vector<32x32xf32>
    %97 = arith.mulf %94, %96 : vector<32x32xf32>
    %c0_35 = arith.constant 0 : index
    %c0_36 = arith.constant 0 : index
    %98 = vector.load %arg7[%c0_35, %c0_36] : memref<1x32xf32, #tpu.memory_space<vmem>>, vector<1x32xf32>
    %99 = vector.broadcast %98 : vector<1x32xf32> to vector<32x32xf32>
    %100 = arith.addf %97, %99 : vector<32x32xf32>
    %c0_37 = arith.constant 0 : index
    %c0_38 = arith.constant 0 : index
    %101 = vector.load %arg8[%c0_37, %c0_38] : memref<32x32xf32, #tpu.memory_space<vmem>>, vector<32x32xf32>
    %cst_39 = arith.constant dense<0.000000e+00> : vector<32x32xf32>
    %102 = tpu.matmul %100, %101, %cst_39 {dimension_numbers = #tpu.dot_dimension_numbers<[1], [0], [0], [1], [0, 0, 1, 1], [], []>} : vector<32x32xf32>, vector<32x32xf32>, vector<32x32xf32> -> vector<32x32xf32>
    %c0_40 = arith.constant 0 : index
    %c0_41 = arith.constant 0 : index
    %103 = vector.load %arg9[%c0_40, %c0_41] : memref<1x32xf32, #tpu.memory_space<vmem>>, vector<1x32xf32>
    %104 = vector.broadcast %103 : vector<1x32xf32> to vector<32x32xf32>
    %105 = arith.addf %102, %104 : vector<32x32xf32>
    %cst_42 = arith.constant 5.000000e-01 : f32
    %106 = vector.broadcast %cst_42 : f32 to vector<32x32xf32>
    %107 = arith.mulf %106, %105 : vector<32x32xf32>
    %cst_43 = arith.constant 0.707106769 : f32
    %108 = vector.broadcast %cst_43 : f32 to vector<32x32xf32>
    %109 = arith.mulf %105, %108 : vector<32x32xf32>
    %110 = math.erf %109 : vector<32x32xf32>
    %cst_44 = arith.constant 1.000000e+00 : f32
    %111 = vector.broadcast %cst_44 : f32 to vector<32x32xf32>
    %112 = arith.addf %111, %110 : vector<32x32xf32>
    %113 = arith.mulf %107, %112 : vector<32x32xf32>
    %c0_45 = arith.constant 0 : index
    %c0_46 = arith.constant 0 : index
    %114 = vector.load %arg10[%c0_45, %c0_46] : memref<32x32xf32, #tpu.memory_space<vmem>>, vector<32x32xf32>
    %cst_47 = arith.constant dense<0.000000e+00> : vector<32x32xf32>
    %115 = tpu.matmul %113, %114, %cst_47 {dimension_numbers = #tpu.dot_dimension_numbers<[1], [0], [0], [1], [0, 0, 1, 1], [], []>} : vector<32x32xf32>, vector<32x32xf32>, vector<32x32xf32> -> vector<32x32xf32>
    %c0_48 = arith.constant 0 : index
    %c0_49 = arith.constant 0 : index
    %116 = vector.load %arg11[%c0_48, %c0_49] : memref<1x32xf32, #tpu.memory_space<vmem>>, vector<1x32xf32>
    %117 = vector.broadcast %116 : vector<1x32xf32> to vector<32x32xf32>
    %118 = arith.addf %115, %117 : vector<32x32xf32>
    %119 = arith.addf %100, %118 : vector<32x32xf32>
    %cst_50 = arith.constant dense<0.000000e+00> : vector<32xf32>
    %120 = vector.multi_reduction <add>, %119, %cst_50 [1] : vector<32x32xf32> to vector<32xf32>
    %121 = vector.shape_cast %120 : vector<32xf32> to vector<32x1xf32>
    %cst_51 = arith.constant 3.200000e+01 : f32
    %122 = vector.broadcast %cst_51 : f32 to vector<32x1xf32>
    %123 = arith.divf %121, %122 : vector<32x1xf32>
    %124 = vector.broadcast %123 : vector<32x1xf32> to vector<32x32xf32>
    %125 = arith.subf %119, %124 : vector<32x32xf32>
    %126 = arith.mulf %125, %125 : vector<32x32xf32>
    %cst_52 = arith.constant dense<0.000000e+00> : vector<32xf32>
    %127 = vector.multi_reduction <add>, %126, %cst_52 [1] : vector<32x32xf32> to vector<32xf32>
    %128 = vector.shape_cast %127 : vector<32xf32> to vector<32x1xf32>
    %cst_53 = arith.constant 3.200000e+01 : f32
    %129 = vector.broadcast %cst_53 : f32 to vector<32x1xf32>
    %130 = arith.divf %128, %129 : vector<32x1xf32>
    %cst_54 = arith.constant 9.99999974E-6 : f32
    %131 = vector.broadcast %cst_54 : f32 to vector<32x1xf32>
    %132 = arith.addf %130, %131 : vector<32x1xf32>
    %133 = math.rsqrt %132 : vector<32x1xf32>
    %134 = vector.broadcast %133 : vector<32x1xf32> to vector<32x32xf32>
    %135 = arith.mulf %125, %134 : vector<32x32xf32>
    %c0_55 = arith.constant 0 : index
    %c0_56 = arith.constant 0 : index
    %136 = vector.load %arg12[%c0_55, %c0_56] : memref<1x32xf32, #tpu.memory_space<vmem>>, vector<1x32xf32>
    %137 = vector.broadcast %136 : vector<1x32xf32> to vector<32x32xf32>
    %138 = arith.mulf %135, %137 : vector<32x32xf32>
    %c0_57 = arith.constant 0 : index
    %c0_58 = arith.constant 0 : index
    %139 = vector.load %arg13[%c0_57, %c0_58] : memref<1x32xf32, #tpu.memory_space<vmem>>, vector<1x32xf32>
    %140 = vector.broadcast %139 : vector<1x32xf32> to vector<32x32xf32>
    %141 = arith.addf %138, %140 : vector<32x32xf32>
    %142 = vector.shape_cast %141 : vector<32x32xf32> to vector<4x8x32xf32>
    %c0_59 = arith.constant 0 : index
    %c0_60 = arith.constant 0 : index
    %c0_61 = arith.constant 0 : index
    %143 = vector.load %arg14[%c0_59, %c0_60, %c0_61] : memref<4x8x32xf32, #tpu.memory_space<vmem>>, vector<4x8x32xf32>
    tpu.vector_store %arg14[%c0_59, %c0_60, %c0_61], %142 {strides = array<i32>} : memref<4x8x32xf32, #tpu.memory_space<vmem>>, vector<4x8x32xf32>,
    return
  }
  func.func @transform_0(%arg0: i32) -> (i32, i32, i32) {
    %c0_i32 = arith.constant 0 : i32
    %c0_i32_0 = arith.constant 0 : i32
    %c0_i32_1 = arith.constant 0 : i32
    return %arg0, %c0_i32, %c0_i32_0 : i32, i32, i32
  }
  func.func @transform_1(%arg0: i32) -> (i32, i32) {
    %c0_i32 = arith.constant 0 : i32
    %c0_i32_0 = arith.constant 0 : i32
    %c0_i32_1 = arith.constant 0 : i32
    return %c0_i32, %c0_i32_0 : i32, i32
  }
  func.func @transform_2(%arg0: i32) -> (i32, i32) {
    %c0_i32 = arith.constant 0 : i32
    %c0_i32_0 = arith.constant 0 : i32
    %c0_i32_1 = arith.constant 0 : i32
    return %c0_i32, %c0_i32_0 : i32, i32
  }
  func.func @transform_3(%arg0: i32) -> (i32, i32) {
    %c0_i32 = arith.constant 0 : i32
    %c0_i32_0 = arith.constant 0 : i32
    %c0_i32_1 = arith.constant 0 : i32
    return %c0_i32, %c0_i32_0 : i32, i32
  }
  func.func @transform_4(%arg0: i32) -> (i32, i32) {
    %c0_i32 = arith.constant 0 : i32
    %c0_i32_0 = arith.constant 0 : i32
    %c0_i32_1 = arith.constant 0 : i32
    return %c0_i32, %c0_i32_0 : i32, i32
  }
  func.func @transform_5(%arg0: i32) -> (i32, i32) {
    %c0_i32 = arith.constant 0 : i32
    %c0_i32_0 = arith.constant 0 : i32
    %c0_i32_1 = arith.constant 0 : i32
    return %c0_i32, %c0_i32_0 : i32, i32
  }
  func.func @transform_6(%arg0: i32) -> (i32, i32) {
    %c0_i32 = arith.constant 0 : i32
    %c0_i32_0 = arith.constant 0 : i32
    %c0_i32_1 = arith.constant 0 : i32
    return %c0_i32, %c0_i32_0 : i32, i32
  }
  func.func @transform_7(%arg0: i32) -> (i32, i32) {
    %c0_i32 = arith.constant 0 : i32
    %c0_i32_0 = arith.constant 0 : i32
    %c0_i32_1 = arith.constant 0 : i32
    return %c0_i32, %c0_i32_0 : i32, i32
  }
  func.func @transform_8(%arg0: i32) -> (i32, i32) {
    %c0_i32 = arith.constant 0 : i32
    %c0_i32_0 = arith.constant 0 : i32
    %c0_i32_1 = arith.constant 0 : i32
    return %c0_i32, %c0_i32_0 : i32, i32
  }
  func.func @transform_9(%arg0: i32) -> (i32, i32) {
    %c0_i32 = arith.constant 0 : i32
    %c0_i32_0 = arith.constant 0 : i32
    %c0_i32_1 = arith.constant 0 : i32
    return %c0_i32, %c0_i32_0 : i32, i32
  }
  func.func @transform_10(%arg0: i32) -> (i32, i32) {
    %c0_i32 = arith.constant 0 : i32
    %c0_i32_0 = arith.constant 0 : i32
    %c0_i32_1 = arith.constant 0 : i32
    return %c0_i32, %c0_i32_0 : i32, i32
  }
  func.func @transform_11(%arg0: i32) -> (i32, i32) {
    %c0_i32 = arith.constant 0 : i32
    %c0_i32_0 = arith.constant 0 : i32
    %c0_i32_1 = arith.constant 0 : i32
    return %c0_i32, %c0_i32_0 : i32, i32
  }
  func.func @transform_12(%arg0: i32) -> (i32, i32) {
    %c0_i32 = arith.constant 0 : i32
    %c0_i32_0 = arith.constant 0 : i32
    %c0_i32_1 = arith.constant 0 : i32
    return %c0_i32, %c0_i32_0 : i32, i32
  }
  func.func @transform_13(%arg0: i32) -> (i32, i32, i32) {
    %c0_i32 = arith.constant 0 : i32
    %c0_i32_0 = arith.constant 0 : i32
    %c0_i32_1 = arith.constant 0 : i32
    return %arg0, %c0_i32, %c0_i32_0 : i32, i32, i32
  }
}

</mosaic_0001>

<bundles_post_ra>
// kernel: tpu_custom_call.1
= control target key start
LH: loop header
LB: loop body
LE: loop exit
PB: predicated region body
PF: predicated region fallthrough
CT: control target
= control target key end

     0   :  { %s5782_s0 = inlined_call_operand.hbm [shape: f32[8,8,32], index: 0, kind: input, shape index: {}]   ;;  %s5783_s1 = inlined_call_operand.hbm [shape: f32[32,96], index: 1, kind: input, shape index: {}]   ;;  %s5784_s2 = inlined_call_operand.vmem [shape: f32[1,96], index: 2, kind: input, shape index: {}]   ;;  %s5785_s3 = inlined_call_operand.hbm [shape: f32[32,32], index: 3, kind: input, shape index: {}]   ;;  %s5786_s4 = inlined_call_operand.vmem [shape: f32[1,32], index: 4, kind: input, shape index: {}]   ;;  %s5787_s5 = inlined_call_operand.hbm [shape: f32[1,32], index: 5, kind: input, shape index: {}]   ;;  %s5788_s6 = inlined_call_operand.hbm [shape: f32[1,32], index: 6, kind: input, shape index: {}]   ;;  %s5789_s7 = inlined_call_operand.hbm [shape: f32[32,32], index: 7, kind: input, shape index: {}]   ;;  %s5790_s8 = inlined_call_operand.hbm [shape: f32[1,32], index: 8, kind: input, shape index: {}]   ;;  %s5791_s9 = inlined_call_operand.vmem [shape: f32[32,32], index: 9, kind: input, shape index: {}]   ;;  %s5792_s10 = inlined_call_operand.vmem [shape: f32[1,32], index: 10, kind: input, shape index: {}]   ;;  %s5793_s11 = inlined_call_operand.vmem [shape: f32[1,32], index: 11, kind: input, shape index: {}]   ;;  %s5794_s12 = inlined_call_operand.vmem [shape: f32[1,32], index: 12, kind: input, shape index: {}]   ;;  %s5795_s13 = inlined_call_operand.hbm [shape: f32[8,8,32], index: 13, kind: output, shape index: {}]  }
   0x1   :  { %5802 = sst [smem:[#allocation20_spill]] %s5783_s1 }
   0x2   :  { %5803 = sst [smem:[#allocation21_spill]] %s5791_s9 }
   0x3   :  { %5804 = sst [smem:[#allocation22_spill]] %s5792_s10 }
   0x4   :  { %5805 = sst [smem:[#allocation23_spill]] %s5793_s11 }
   0x5   :  { %5806 = sst [smem:[#allocation24_spill]] %s5794_s12 }
   0x6   :  { %5807 = sst [smem:[#allocation25_spill]] %s5795_s13 }
   0x7   :  { %18 = vsyncpa [#allocation3], 0 }
   0x8   :  { %20 = vsyncpa [#allocation3 + $0x1], 0 }
   0x9   :  { %21 = vsyncpa [#allocation6], 0 }
   0xa   :  { %22 = vsyncpa [#allocation9], 0 }
   0xb   :  { %23 = vsyncpa [#allocation12], 0 }
   0xc   :  { %24 = vsyncpa [#allocation4], 0 }
   0xd   :  { %26 = vsyncpa [#allocation4 + $0x1], 0  ;;  %s5048_s25 = smov 0   ;;  %s5050_s26 = smov 0  }
   0xe   :  { %s5052_s27 = smov 0   ;;  %s5054_s28 = smov 0  }
   0xf LB: > { %s4951_s29 = smov [#allocation5]   ;;  %s5069_s14 = sadd.s32 4294967295, %s4949_s28   ;;  %s4949_s28 = sphi %s5054_s28, %s5837_s28   ;;  %s4945_s27 = sphi %s5052_s27, %s5836_s27   ;;  %s4941_s26 = sphi %s5050_s26, %s5835_s26   ;;  %s4937_s25 = sphi %s5048_s25, %s5834_s25  }
  0x10   : > { %s353_s30 = sshll.u32 %s4951_s29, 4  ;;  %p4012_p0 = scmp.ge.s32.totalorder %s4949_s28, 1  ;;  %s5074_s30 = int_to_ptr.vmem [resolvable:$true] %s353_s30 }
  0x11   : > { %p5798_p1 = scmp.eq.s32.totalorder %s5069_s14, 0  ;;  %p341_p2 = scmp.lt.s32.totalorder %s4949_s28, 3 }
  0x12   : > { %s4952_s16 = smov [#allocation8]   ;;  %s4953_s19 = smov [#allocation11]  }
  0x13   : > { %p5076_p3 = pnand %p4012_p0, %p341_p2  ;;  %s386_s17 = sshll.u32 %s4952_s16, 4  ;;  %s5089_s17 = int_to_ptr.vmem [resolvable:$true] %s386_s17 }
  0x14   : > { %s407_s20 = sshll.u32 %s4953_s19, 4  ;;  %s5810_s1 = sld [smem:[#allocation20_spill]]  ;;  %s5091_s20 = int_to_ptr.vmem [resolvable:$true] %s407_s20 }
  0x15   : > { %s5808_s15 = scalar_select %p5076_p3, 1, 0 }
  0x16   : > { %p4483_p5 = pneg %p5076_p3 }
  0x18   : > { %p5085_p6 = pnand %p4483_p5, %p5798_p1 }
  0x1a   : > { %s4673_s23 = scalar_lea.hbm %s5810_s1, 512  ;;  %p5101_p8 = pneg %p5085_p6 }
  0x1b   : > { %p4674_p7 = scmp.ne.s32.totalorder %s5810_s1, %s4673_s23  ;;  %p4680_p11 = scmp.lt.u32.totalorder %s4673_s23, %s5810_s1 }
  0x1d   : > { %p4676_p9 = pnand %p5101_p8, %p4674_p7 }
  0x1f   : > { %p4677_p10 = pneg %p4676_p9 }
  0x21   : > { %p4682_p12 = pnand %p4680_p11, %p4677_p10 }
  0x23   : > { %4685 = shalt.err (!%p4682_p12)
}
  0x24   : > { %s4686_s21 = scalar_lea.vmem %s5074_s30, 512  ;;  %p4694_p5 = scmp.lt.s32.totalorder %s5074_s30, %s5074_s30 }
  0x25   : > { %p4687_p13 = scmp.ne.s32.totalorder %s5074_s30, %s4686_s21  ;;  %p4695_p4 = scmp.lt.s32.totalorder %s4686_s21, %s4686_s21 }
  0x27   : > { %p4689_p0 = pnand %p4687_p13, %p5101_p8  ;;  %p4696_p7 = por %p4695_p4, %p4694_p5 }
  0x29   : > { %p4690_p2 = pneg %p4689_p0 }
  0x2b   : > { %p4697_p9 = pnand %p4696_p7, %p4690_p2 }
  0x2d   : > { %4700 = shalt.err (!%p4697_p9)
}
  0x2e   : > { %s5800_s22 = smov 128   ;;  %s4955_s13 = smov 8  }
  0x2f   : > { %4486 = dma.hbm_to_vmem [thread:$0]  (!%p5085_p6), %s5810_s1, 512, %s5074_s30, [#allocation6], %s5800_s22, %s5800_s22, %s4955_s13  }
  0x30   : > { %s4701_s21 = scalar_lea.hbm %s5787_s5, 16 }
  0x31   : > { %p4702_p4 = scmp.ne.s32.totalorder %s5787_s5, %s4701_s21  ;;  %p4708_p12 = scmp.lt.u32.totalorder %s4701_s21, %s5787_s5 }
  0x33   : > { %p4704_p10 = pnand %p4702_p4, %p5101_p8 }
  0x35   : > { %p4705_p11 = pneg %p4704_p10 }
  0x37   : > { %p4710_p13 = pnand %p4708_p12, %p4705_p11 }
  0x39   : > { %4713 = shalt.err (!%p4710_p13)
}
  0x3a   : > { %s4714_s30 = scalar_lea.vmem %s5089_s17, 16  ;;  %s4721_s11 = scalar_lea.vmem %s5089_s17, 32 }
  0x3b   : > { %p4715_p0 = scmp.ne.s32.totalorder %s5089_s17, %s4714_s30  ;;  %p4722_p7 = scmp.lt.s32.totalorder %s5089_s17, %s5089_s17 }
  0x3c   : > { %p4723_p9 = scmp.lt.s32.totalorder %s4721_s11, %s4714_s30 }
  0x3d   : > { %p4717_p2 = pnand %p4715_p0, %p5101_p8 }
  0x3e   : > { %p4724_p4 = por %p4723_p9, %p4722_p7 }
  0x3f   : > { %p4718_p5 = pneg %p4717_p2 }
  0x41   : > { %p4725_p10 = pnand %p4724_p4, %p4718_p5 }
  0x43   : > { %4728 = shalt.err (!%p4725_p10)
}
  0x44   : > { %4492 = dma.hbm_to_vmem [thread:$0]  (!%p5085_p6), %s5787_s5, 16, %s5089_s17, [#allocation9]  }
  0x45   : > { %s4729_s24 = scalar_lea.hbm %s5789_s7, 512 }
  0x46   : > { %p4730_p11 = scmp.ne.s32.totalorder %s5789_s7, %s4729_s24  ;;  %p4736_p0 = scmp.lt.u32.totalorder %s4729_s24, %s5789_s7 }
  0x48   : > { %p4732_p12 = pnand %p4730_p11, %p5101_p8 }
  0x4a   : > { %p4733_p13 = pneg %p4732_p12 }
  0x4c   : > { %p4738_p2 = pnand %p4736_p0, %p4733_p13 }
  0x4e   : > { %4741 = shalt.err (!%p4738_p2)
}
  0x4f   : > { %s4742_s17 = scalar_lea.vmem %s5091_s20, 512  ;;  %p4750_p4 = scmp.lt.s32.totalorder %s5091_s20, %s5091_s20 }
  0x50   : > { %p4743_p5 = scmp.ne.s32.totalorder %s5091_s20, %s4742_s17  ;;  %p4751_p10 = scmp.lt.s32.totalorder %s4742_s17, %s4742_s17 }
  0x52   : > { %p4745_p7 = pnand %p4743_p5, %p5101_p8  ;;  %p4752_p11 = por %p4751_p10, %p4750_p4 }
  0x54   : > { %p4746_p9 = pneg %p4745_p7 }
  0x56   : > { %p4753_p12 = pnand %p4752_p11, %p4746_p9 }
  0x58   : > { %4756 = shalt.err (!%p4753_p12)
}
  0x59   : > { %4498 = dma.hbm_to_vmem [thread:$0]  (!%p5085_p6), %s5789_s7, 512, %s5091_s20, [#allocation12], %s5800_s22, %s5800_s22, %s4955_s13  }
  0x5a   : > { %s4956_s10 = smov [#allocation7]   ;;  %s4957_s23 = smov [#allocation10]  }
  0x5b   : > { %s369_s12 = sshll.u32 %s4956_s10, 4  ;;  %s397_s24 = sshll.u32 %s4957_s23, 4  ;;  %s370_s12 = int_to_ptr.vmem [resolvable:$true] %s369_s12  ;;  %s398_s24 = int_to_ptr.vmem [resolvable:$true] %s397_s24 }
  0x5c   : > { %s4757_s21 = scalar_lea.hbm %s5785_s3, 512 }
  0x5d   : > { %p4758_p13 = scmp.ne.s32.totalorder %s5785_s3, %s4757_s21  ;;  %p4764_p5 = scmp.lt.u32.totalorder %s4757_s21, %s5785_s3 }
  0x5f   : > { %p4760_p0 = pnand %p4758_p13, %p5101_p8 }
  0x61   : > { %p4761_p2 = pneg %p4760_p0 }
  0x63   : > { %p4766_p7 = pnand %p4764_p5, %p4761_p2 }
  0x65   : > { %4769 = shalt.err (!%p4766_p7)
}
  0x66   : > { %s4770_s20 = scalar_lea.vmem %s370_s12, 512  ;;  %p4778_p11 = scmp.lt.s32.totalorder %s370_s12, %s370_s12 }
  0x67   : > { %p4771_p9 = scmp.ne.s32.totalorder %s370_s12, %s4770_s20  ;;  %p4779_p12 = scmp.lt.s32.totalorder %s4770_s20, %s4770_s20 }
  0x69   : > { %p4773_p4 = pnand %p4771_p9, %p5101_p8  ;;  %p4780_p1 = por %p4779_p12, %p4778_p11 }
  0x6b   : > { %p4774_p10 = pneg %p4773_p4 }
  0x6d   : > { %p4781_p3 = pnand %p4780_p1, %p4774_p10 }
  0x6f   : > { %4784 = shalt.err (!%p4781_p3)
}
  0x70   : > { %4489 = dma.hbm_to_vmem [thread:$0]  (!%p5085_p6), %s5785_s3, 512, %s370_s12, [#allocation6], %s5800_s22, %s5800_s22, %s4955_s13  }
  0x71   : > { %s4785_s29 = scalar_lea.hbm %s5788_s6, 16 }
  0x72   : > { %p4786_p1 = scmp.ne.s32.totalorder %s5788_s6, %s4785_s29  ;;  %p4792_p0 = scmp.lt.u32.totalorder %s4785_s29, %s5788_s6 }
  0x74   : > { %p4788_p3 = pnand %p4786_p1, %p5101_p8 }
  0x76   : > { %p4789_p13 = pneg %p4788_p3 }
  0x78   : > { %p4794_p2 = pnand %p4792_p0, %p4789_p13 }
  0x7a   : > { %4797 = shalt.err (!%p4794_p2)
}
  0x7b   : > { %s4798_s11 = scalar_lea.vmem %s398_s24, 16  ;;  %s4805_s12 = scalar_lea.vmem %s398_s24, 32 }
  0x7c   : > { %p4799_p5 = scmp.ne.s32.totalorder %s398_s24, %s4798_s11  ;;  %p4806_p4 = scmp.lt.s32.totalorder %s398_s24, %s398_s24 }
  0x7d   : > { %p4807_p10 = scmp.lt.s32.totalorder %s4805_s12, %s4798_s11 }
  0x7e   : > { %p4801_p7 = pnand %p4799_p5, %p5101_p8 }
  0x7f   : > { %p4808_p11 = por %p4807_p10, %p4806_p4 }
  0x80   : > { %p4802_p9 = pneg %p4801_p7 }
  0x82   : > { %p4809_p12 = pnand %p4808_p11, %p4802_p9 }
  0x84   : > { %4812 = shalt.err (!%p4809_p12)
}
  0x85   : > { %4495 = dma.hbm_to_vmem [thread:$0]  (!%p5085_p6), %s5788_s6, 16, %s398_s24, [#allocation9]  }
  0x86   : > { %s4958_s9 = smov [#allocation13]   ;;  %s4813_s19 = scalar_lea.hbm %s5790_s8, 16 }
  0x87   : > { %s421_s10 = sshll.u32 %s4958_s9, 4  ;;  %p4814_p1 = scmp.ne.s32.totalorder %s5790_s8, %s4813_s19  ;;  %s422_s10 = int_to_ptr.vmem [resolvable:$true] %s421_s10 }
  0x88   : > { %p4820_p0 = scmp.lt.u32.totalorder %s4813_s19, %s5790_s8 }
  0x89   : > { %p4816_p3 = pnand %p4814_p1, %p5101_p8 }
  0x8b   : > { %p4817_p13 = pneg %p4816_p3 }
  0x8d   : > { %p4822_p2 = pnand %p4820_p0, %p4817_p13 }
  0x8f   : > { %4825 = shalt.err (!%p4822_p2)
}
  0x90   : > { %s4826_s24 = scalar_lea.vmem %s422_s10, 16  ;;  %s4833_s12 = scalar_lea.vmem %s422_s10, 32 }
  0x91   : > { %p4827_p5 = scmp.ne.s32.totalorder %s422_s10, %s4826_s24  ;;  %p4834_p4 = scmp.lt.s32.totalorder %s422_s10, %s422_s10 }
  0x92   : > { %p4835_p10 = scmp.lt.s32.totalorder %s4833_s12, %s4826_s24 }
  0x93   : > { %p4829_p7 = pnand %p4827_p5, %p5101_p8 }
  0x94   : > { %p4836_p11 = por %p4835_p10, %p4834_p4 }
  0x95   : > { %p4830_p9 = pneg %p4829_p7 }
  0x97   : > { %p4837_p12 = pnand %p4836_p11, %p4830_p9 }
  0x99   : > { %4840 = shalt.err (!%p4837_p12)
}
  0x9a   : > { %4501 = dma.hbm_to_vmem [thread:$0]  (!%p5085_p6), %s5790_s8, 16, %s422_s10, [#allocation12]  }
  0x9b   : > { %s4011_s16 = sadd.s32 4294967294, %s4949_s28   ;;  %s5234_s18 = sadd.s32 1, %s4949_s28  }
  0x9c   : > { %s36_s9 = ssub.s32 %s4949_s28, %s5234_s18  ;;  %s39_s23 = sadd.s32 1, %s4945_s27 }
  0x9d   : > { %p37_p8 = scmp.eq.s32.totalorder %s36_s9, 0  ;;  %p46_p1 = scmp.ne.s32.totalorder %s4945_s27, %s4941_s26 }
  0x9e   : > { %p47_p3 = scmp.eq.s32.totalorder %s4949_s28, 0  ;;  %p52_p13 = scmp.ne.s32.totalorder %s4941_s26, %s4937_s25 }
  0x9f   : > { %s5245_s29 = scalar_select %p37_p8, %s4945_s27, %s39_s23  }
  0xa0   : > { %p5247_p0 = por %p47_p3, %p46_p1  ;;  %p5813_p2 = scmp.eq.s32.totalorder %s5069_s14, 0 }
  0xa1   : > { %p328_p5 = scmp.eq.s32.totalorder %s5069_s14, 1  ;;  %p334_p7 = scmp.eq.s32.totalorder %s4011_s16, 1 }
  0xa2   : > { %p5253_p6 = por %p5813_p2, %p52_p13  ;;  %p4516_p9 = scmp.lt.s32.totalorder %s4949_s28, 2 }
  0xa3   : > { %s444_s21 = sand.u32 1, %s4945_s27   ;;  %p5260_p4 = por %p328_p5, %p46_p1 }
  0xa4   : > { %p5264_p10 = por %p334_p7, %p52_p13  ;;  %s4020_s11 = sshll.u32 %s444_s21, 5 }
  0xa5   : > { %s5815_s30 = scalar_select %p5260_p4, 1, 0 }
  0xa6   : > { %s5816_s17 = scalar_select %p5264_p10, 1, 0 }
  0xa7   : > { %s4109_s24 = sshll.u32 %s4949_s28, 9  ;;  %s448_s16 = scalar_lea.vmem [#allocation2], %s4020_s11 }
  0xa8   : > { %s5272_s1 = scalar_lea.hbm %s5782_s0, %s4109_s24  ;;  %s455_s9 = sshll.u32 %s448_s16, 4  ;;  %s5274_s9 = int_to_ptr.vmem [resolvable:$true] %s455_s9 }
  0xa9   : > { %p5278_p11 = pnand %p4516_p9, %p5247_p0  ;;  %s5282_s22 = scalar_lea.sflag [#allocation3], %s444_s21 }
  0xaa   : > { %s4841_s12 = scalar_lea.hbm %s5272_s1, 512  ;;  %s4846_s19 = scalar_lea.hbm %s5782_s0, 1024 }
  0xab   : > { %p4842_p12 = scmp.ne.s32.totalorder %s5272_s1, %s4841_s12  ;;  %p4843_p8 = pneg %p5278_p11 }
  0xac   : > { %p4847_p13 = scmp.lt.u32.totalorder %s5272_s1, %s5782_s0  ;;  %p4848_p0 = scmp.lt.u32.totalorder %s4846_s19, %s4841_s12 }
  0xad   : > { %p4844_p1 = pnand %p4843_p8, %p4842_p12  ;;  %p4850_p5 = scmp.lt.u32.totalorder %s4841_s12, %s5272_s1 }
  0xae   : > { %p4849_p2 = por %p4848_p0, %p4847_p13 }
  0xaf   : > { %p4845_p3 = pneg %p4844_p1 }
  0xb0   : > { %p4851_p7 = por %p4850_p5, %p4849_p2 }
  0xb2   : > { %p4852_p9 = pnand %p4851_p7, %p4845_p3 }
  0xb4   : > { %4855 = shalt.err (!%p4852_p9)
}
  0xb5   : > { %s4856_s21 = scalar_lea.vmem %s5274_s9, 512  ;;  %s4959_s11 = smov [#allocation2]  }
  0xb6   : > { %p4857_p12 = scmp.ne.s32.totalorder %s5274_s9, %s4856_s21  ;;  %s4861_s24 = sshll.u32 %s4959_s11, 4  ;;  %s4862_s24 = int_to_ptr.vmem [resolvable:$false] %s4861_s24 }
  0xb7   : > { %s4863_s20 = scalar_lea.vmem %s4862_s24, 1024  ;;  %p4864_p4 = scmp.lt.s32.totalorder %s5274_s9, %s4862_s24 }
  0xb8   : > { %p4859_p1 = pnand %p4857_p12, %p4843_p8  ;;  %p4865_p13 = scmp.lt.s32.totalorder %s4863_s20, %s4856_s21 }
  0xba   : > { %p4860_p10 = pneg %p4859_p1  ;;  %p4866_p0 = por %p4865_p13, %p4864_p4 }
  0xbc   : > { %p4867_p2 = pnand %p4866_p0, %p4860_p10 }
  0xbe   : > { %4870 = shalt.err (!%p4867_p2)
}
  0xbf   : > { %s5818_s12 = smov 128   ;;  %p5819_p8 = scmp.ne.s32.totalorder %s5808_s15, 0 }
  0xc0   : > { %4505 = dma.hbm_to_vmem [thread:$0]  (!%p5278_p11), %s5272_s1, 512, %s5274_s9, %s5282_s22, %s5818_s12, %s5818_s12, %s4955_s13  }
  0xc1   : > { %467 = sbr.rel (%p5819_p8) target bundleno = 4436 (0x1154), region = 72  ;;  %s5316_s19 = sand.u32 (!%p5819_p8), 1, %s4941_s26  }
  0xc2   : > { %s4024_s16 = sshll.u32 (!%p5819_p8), %s5316_s19, 5  ;;  %s470_s21 = scalar_lea.sflag (!%p5819_p8), [#allocation3], %s5316_s19 }
  0xc3   : > { %s5322_s23 = scalar_lea.vmem (!%p5819_p8), [#allocation2], %s4024_s16 }
  0xc8   : > { %4916 = dma.done.wait (%p5253_p6), %s470_s21, 512  }
  0xc9   : > { %4918 = vsyncadd (%p5253_p6), %s470_s21, 4294966784  ;;  %p5820_p4 = scmp.eq.s32.totalorder %s5069_s14, 0 }
  0xcb   : > { %4920 = dma.done.wait (%p5820_p4), [#allocation6], 1024   ;;  %p5821_p10 = pmov %p5820_p4 }
  0xcc   : > { %p5822_p11 = pmov %p5820_p4 }
  0xcd   : > { %4922 = vsyncadd (%p5821_p10), [#allocation6], 4294966272 }
  0xce   : > { %4924 = dma.done.wait (%p5822_p11), [#allocation9], 32   ;;  %p5823_p3 = pmov %p5820_p4 }
  0xd0   : > { %4926 = vsyncadd (%p5823_p3), [#allocation9], 4294967264  ;;  %p5824_p5 = pmov %p5823_p3 }
  0xd1   : > { %p5825_p7 = pmov %p5823_p3 }
  0xd2   : > { %4928 = dma.done.wait (%p5824_p5), [#allocation12], 528  }
  0xd3   : > { %4930 = vsyncadd (%p5825_p7), [#allocation12], 4294966768  ;;  %vm557_vm0 = vcmask 261120   ;;  %v546_v0 = vld [vmem:[#allocation5] sm:$0xff]  ;;  %v547_v1 = vld [vmem:[#allocation5 + $0x8] sm:$0xff]  ;;  %v4960_v10 = vmov 0.0  }
  0xd4   : > { %v548_v2 = vld [vmem:[#allocation5 + $0x10] sm:$0xff]  ;;  %v4423_v3 = vpack.c.bf16 %v547_v1, %v546_v0  ;;  %v549_v4 = vld [vmem:[#allocation5 + $0x18] sm:$0xff]  ;;  %v542_v5 = vld [vmem:[%s5322_s23] sm:$0xff]  ;;  %4221 = vmatprep.subr.mxu1 %v4960_v10  ;;  %vm4961_vm1 = vmmov 0   ;;  %s4962_s13 = smov 96   ;;  %vm662_vm2 = vcmask 64512  }
  0xd5   : > { %v4427_v6 = vpack.c.bf16 %v549_v4, %v548_v2  ;;  %4215 = vmatprep.mubr.msk.f32.mxu0 %vm557_vm0, %v542_v5  ;;  %v543_v7 = vld [vmem:[%s5322_s23 + $0x8] sm:$0xff]  ;;  %v544_v8 = vld [vmem:[%s5322_s23 + $0x10] sm:$0xff]  ;;  %v545_v9 = vld [vmem:[%s5322_s23 + $0x18] sm:$0xff]  ;;  %4223 = vmatprep.mubr.msk.f32.mxu1 %vm4961_vm1, %v4960_v10  ;;  %s4963_s10 = smov 64   ;;  %s4964_s1 = smov 88   ;;  %vm3352_vm3 = vcmask 130048  }
  0xd6   : > { %4424 = vmatprep.subr.bf16.mxu0 %v4423_v3  ;;  %v4032_v11 = vld [vmem:[%s5784_s2] ss:$0 sm:$0xff]  ;;  %s4965_s9 = smov 120   ;;  %s4966_s11 = smov 56   ;;  %vm3357_vm4 = vcmask 195584  }
  0xd7   : > { %4426 = vmatpush3.bf16.msra.mxu0 %v4423_v3  ;;  %s4967_s24 = smov 80   ;;  %s4968_s20 = smov 112  }
  0xd8   : > { %4428 = vmatprep.subr.bf16.mxu0 %v4427_v6  ;;  %s4969_s12 = smov 48   ;;  %s4970_s21 = smov 72  }
  0xd9   : > { %s4971_s15 = smov 104   ;;  %s4972_s22 = smov 40  }
  0xda   : > { %p5831_p9 = scmp.ne.s32.totalorder %s5815_s30, 0 }
  0xdb   : > { %4430 = vmatpush3.bf16.msra.mxu0 %v4427_v6 }
  0xdc   : > { %4236 = vmatprep.subr.mxu0 %v4960_v10 }
  0xde   : > { %4216 = vmatmul.mubr.msk.f32.vlgmr.msra.gmra.mrb[0].mxu0 %vm557_vm0, %v543_v7 }
  0xdf   : > { %4218 = vmatprep.mubr.msk.f32.mxu0 %vm557_vm0, %v544_v8 }
  0xe2   : > { %4219 = vmatmul.mubr.msk.f32.gmra.mrb[2].mxu0 %vm557_vm0, %v545_v9 }
  0xe3   : > { %4238 = vmatprep.mubr.msk.f32.mxu0 %vm4961_vm1, %v4960_v10 }
 0x1b1   : > { %v4217_v12 = vpop.f32.mrb[0].mxu0 }
 0x1b2   : > { %v636_v13 = vpop.f32.mrb[1].mxu0  ;;  %v5360_v17 = vadd.f32 %v4217_v12, %v4032_v11 }
 0x1b3   : > { %v5357_v14 = vadd.f32 %v4032_v11, %v636_v13 }
 0x1b4   : > { %v5380_v24 = vmul.f32 0.35355338, %v5360_v17 }
 0x1b5   : > { %v4220_v15 = vpop.f32.mrb[2].mxu0  ;;  %660 = vrot.lane.b32.xlu0 %v5357_v14, %s4962_s13  ;;  %v5372_v21 = vmul.f32 0.35355338, %v5357_v14 }
 0x1b6   : > { %v646_v16 = vpop.f32.mrb[3].mxu0  ;;  %v5364_v19 = vadd.f32 %v4220_v15, %v4032_v11 }
 0x1b7   : > { %v5362_v18 = vadd.f32 %v4032_v11, %v646_v16 }
 0x1b8   : > { %v5393_v27 = vmul.f32 0.35355338, %v5364_v19 }
 0x1b9   : > { %817 = vrot.lane.b32.xlu1 %v5362_v18, %s4962_s13  ;;  %739 = vrot.lane.b32.xlu0 %v5360_v17, %s4962_s13  ;;  %v5390_v26 = vmul.f32 0.35355338, %v5362_v18 }
 0x1bd   : > { %895 = vrot.lane.b32.xlu1 %v5364_v19, %s4962_s13  ;;  %s4973_s13 = smov 8  }
 0x227   : > { %v661_v20 = vpop.permute.xlu0 %660 }
 0x228   : > { %4222 = vmatpush3.xpose.msk.msra.mxu1 %vm662_vm2, %v661_v20 }
 0x229   : > { %4226 = vmatprep.subr.mxu1 %v4960_v10 }
 0x22b   : > { %v818_v22 = vpop.permute.xlu1 %817  ;;  %v740_v23 = vpop.permute.xlu0 %739  ;;  %4224 = vmatmul.mubr.msk.f32.vlgmr.msra.gmra.mrb[0].mxu1 %vm662_vm2, %v5372_v21 }
 0x22c   : > { %4227 = vmatpush3.xpose.msk.msra.mxu1 %vm662_vm2, %v740_v23  ;;  %4228 = vmatprep.mubr.msk.f32.mxu1 %vm4961_vm1, %v4960_v10 }
 0x22d   : > { %4231 = vmatprep.subr.mxu1 %v4960_v10 }
 0x22f   : > { %v896_v25 = vpop.permute.xlu1 %895  ;;  %4229 = vmatmul.mubr.msk.f32.vlgmr.msra.gmra.mrb[2].mxu1 %vm662_vm2, %v5380_v24 }
 0x230   : > { %4232 = vmatpush3.xpose.msk.msra.mxu1 %vm662_vm2, %v818_v22  ;;  %4237 = vmatpush3.xpose.msk.msra.mxu0 %vm662_vm2, %v896_v25 }
 0x231   : > { %4233 = vmatprep.mubr.msk.f32.mxu1 %vm4961_vm1, %v4960_v10  ;;  %4241 = vmatprep.subr.mxu1 %v4960_v10 }
 0x232   : > { %4246 = vmatprep.subr.mxu0 %v4960_v10 }
 0x233   : > { %4234 = vmatmul.mubr.msk.f32.vlgmr.msra.gmra.mrb[4].mxu1 %vm662_vm2, %v5390_v26  ;;  %4239 = vmatmul.mubr.msk.f32.vlgmr.msra.gmra.mrb[4].mxu0 %vm662_vm2, %v5393_v27 }
 0x234   : > { %4243 = vmatprep.mubr.msk.f32.mxu1 %vm4961_vm1, %v4960_v10  ;;  %4248 = vmatprep.mubr.msk.f32.mxu0 %vm4961_vm1, %v4960_v10 }
 0x2fe   : > { %v734_v28 = vpop.f32.mrb[0].mxu1 }
 0x2ff   : > { %v4225_v29 = vpop.f32.mrb[1].mxu1  ;;  %v972_v30 = vsel %vm662_vm2, %v734_v28, -inf }
 0x300   : > { %973 = vmax.xlane.f32.xlu0 %v972_v30 }
 0x302   : > { %v812_v31 = vpop.f32.mrb[2].mxu1 }
 0x303   : > { %v4230_v32 = vpop.f32.mrb[3].mxu1  ;;  %v975_v33 = vsel %vm662_vm2, %v812_v31, -inf }
 0x304   : > { %976 = vmax.xlane.f32.xlu1 %v975_v33 }
 0x306   : > { %v890_v34 = vpop.f32.mrb[4].mxu1  ;;  %v968_v35 = vpop.f32.mrb[4].mxu0 }
 0x307   : > { %v4235_v36 = vpop.f32.mrb[5].mxu1  ;;  %v4240_v37 = vpop.f32.mrb[5].mxu0  ;;  %v978_v38 = vsel %vm662_vm2, %v890_v34, -inf  ;;  %v981_v39 = vsel %vm662_vm2, %v968_v35, -inf }
 0x308   : > { %979 = vmax.xlane.f32.xlu0 %v978_v38 }
 0x30c   : > { %982 = vmax.xlane.f32.xlu0 %v981_v39 }
 0x315   : > { %1016 = vrot.lane.b32.xlu1 %v5357_v14, %s4963_s10 }
 0x319   : > { %1168 = vrot.lane.b32.xlu1 %v5362_v18, %s4963_s10 }
 0x31d   : > { %1244 = vrot.lane.b32.xlu1 %v5364_v19, %s4963_s10 }
 0x322   : > { %1092 = vrot.lane.b32.xlu0 %v5360_v17, %s4963_s10  ;;  %s4974_s10 = smov 16  }
 0x38d   : > { %v974_v40 = vpop.xlane.xlu0 %973 }
 0x38e   : > { %v984_v41 = vsub.f32 %v734_v28, %v974_v40 }
 0x390   : > { %v988_v42 = vmul.f32 1.442695, %v984_v41 }
 0x391   : > { %v977_v43 = vpop.xlane.xlu1 %976 }
 0x392   : > { %4581 = vpow2.f32 %v988_v42  ;;  %v985_v46 = vsub.f32 %v812_v31, %v977_v43 }
 0x394   : > { %v990_v50 = vmul.f32 1.442695, %v985_v46 }
 0x395   : > { %v1017_v44 = vpop.permute.xlu1 %1016  ;;  %v980_v45 = vpop.xlane.xlu0 %979 }
 0x396   : > { %4242 = vmatpush3.msra.mxu1 %v1017_v44  ;;  %v986_v58 = vsub.f32 %v890_v34, %v980_v45 }
 0x397   : > { %4251 = vmatprep.subr.mxu1 %v4960_v10 }
 0x398   : > { %v992_v59 = vmul.f32 1.442695, %v986_v58 }
 0x399   : > { %v983_v47 = vpop.xlane.xlu0 %982  ;;  %v1169_v62 = vpop.permute.xlu1 %1168 }
 0x39a   : > { %v987_v48 = vsub.f32 %v968_v35, %v983_v47 }
 0x39c   : > { %v4582_v49 = vpop.eup %4581  ;;  %v994_v51 = vmul.f32 1.442695, %v987_v48 }
 0x39d   : > { %v1093_v52 = vpop.permute.xlu0 %1092  ;;  %v996_v53 = vsel %vm662_vm2, %v4582_v49, 0.0  ;;  %v1245_v63 = vpop.permute.xlu1 %1244 }
 0x39e   : > { %4583 = vpow2.f32 %v994_v51  ;;  %997 = vadd.xlane.f32.xlu1 %v996_v53  ;;  %4247 = vmatpush3.msra.mxu0 %v1093_v52 }
 0x39f   : > { %4256 = vmatprep.subr.mxu0 %v4960_v10  ;;  %4585 = vpow2.f32 %v990_v50 }
 0x3a0   : > { %4587 = vpow2.f32 %v992_v59 }
 0x3a8   : > { %v4584_v54 = vpop.eup %4583 }
 0x3a9   : > { %v1005_v55 = vsel %vm662_vm2, %v4584_v54, 0.0  ;;  %v4586_v56 = vpop.eup %4585 }
 0x3aa   : > { %1006 = vadd.xlane.f32.xlu0 %v1005_v55  ;;  %v999_v57 = vsel %vm662_vm2, %v4586_v56, 0.0  ;;  %v4588_v60 = vpop.eup %4587 }
 0x3ab   : > { %v1002_v61 = vsel %vm662_vm2, %v4588_v60, 0.0 }
 0x3ae   : > { %1000 = vadd.xlane.f32.xlu0 %v999_v57 }
 0x3af   : > { %1400 = vrot.lane.b32.xlu1 %v5360_v17, %s4964_s1 }
 0x3b3   : > { %1398 = vrot.lane.b32.xlu1 %v5380_v24, %s4965_s9 }
 0x3c4   : > { %1322 = vrot.lane.b32.xlu0 %v5357_v14, %s4964_s1 }
 0x3c8   : > { %1320 = vrot.lane.b32.xlu0 %v5372_v21, %s4965_s9 }
 0x3cc   : > { %1478 = vrot.lane.b32.xlu0 %v5362_v18, %s4964_s1 }
 0x3d0   : > { %1476 = vrot.lane.b32.xlu0 %v5390_v26, %s4965_s9 }
 0x3d7   : > { %1003 = vadd.xlane.f32.xlu1 %v1002_v61 }
 0x3e8   : > { %1556 = vrot.lane.b32.xlu1 %v5364_v19, %s4964_s1  ;;  %s4975_s1 = smov 24  }
 0x3ec   : > { %1554 = vrot.lane.b32.xlu1 %v5393_v27, %s4965_s9  ;;  %s4110_s9 = sshll.u32 %s5069_s14, 9  ;;  %s3868_s14 = scalar_lea.sflag [#allocation4], %s5316_s19 }
 0x42b   : > { %v998_v0 = vpop.xlane.xlu1 %997 }
 0x42c   : > { %4589 = vrcp.f32 %v998_v0 }
 0x42f   : > { %v1401_v9 = vpop.permute.xlu1 %1400 }
 0x433   : > { %v1399_v11 = vpop.permute.xlu1 %1398 }
 0x436   : > { %v4590_v1 = vpop.eup %4589 }
 0x437   : > { %v1009_v2 = vmul.f32 %v4590_v1, %v4582_v49  ;;  %v1007_v3 = vpop.xlane.xlu0 %1006 }
 0x439   : > { %4244 = vmatmul.mubr.msk.f32.vlgmr.msra.gmra.mrb[6].mxu1 %vm662_vm2, %v1009_v2 }
 0x43a   : > { %4252 = vmatpush3.msra.mxu1 %v1169_v62  ;;  %4253 = vmatprep.mubr.msk.f32.mxu1 %vm4961_vm1, %v4960_v10 }
 0x43b   : > { %v1001_v4 = vpop.xlane.xlu0 %1000  ;;  %4261 = vmatprep.subr.mxu1 %v4960_v10 }
 0x43c   : > { %4591 = vrcp.f32 %v1001_v4 }
 0x43d   : > { %4593 = vrcp.f32 %v1007_v3 }
 0x43f   : > { %v1323_v13 = vpop.permute.xlu0 %1322 }
 0x443   : > { %v1321_v20 = vpop.permute.xlu0 %1320 }
 0x446   : > { %v4592_v5 = vpop.eup %4591 }
 0x447   : > { %v1011_v6 = vmul.f32 %v4592_v5, %v4586_v56  ;;  %v4594_v7 = vpop.eup %4593  ;;  %v1479_v25 = vpop.permute.xlu0 %1478 }
 0x448   : > { %v1015_v8 = vmul.f32 %v4594_v7, %v4584_v54 }
 0x449   : > { %4249 = vmatmul.mubr.msk.f32.vlgmr.msra.gmra.mrb[6].mxu0 %vm662_vm2, %v1011_v6 }
 0x44a   : > { %4257 = vmatpush3.msra.mxu0 %v1245_v63  ;;  %4258 = vmatprep.mubr.msk.f32.mxu0 %vm4961_vm1, %v4960_v10 }
 0x44b   : > { %4266 = vmatprep.subr.mxu0 %v4960_v10  ;;  %v1477_v28 = vpop.permute.xlu0 %1476 }
 0x44d   : > { %4259 = vmatmul.mubr.msk.f32.vlgmr.msra.gmra.mrb[8].mxu0 %vm662_vm2, %v1015_v8 }
 0x44e   : > { %4268 = vmatprep.mubr.msk.f32.mxu0 %vm4961_vm1, %v4960_v10 }
 0x451   : > { %4267 = vmatpush3.xpose.msk.msra.mxu0 %vm662_vm2, %v1401_v9 }
 0x452   : > { %4276 = vmatprep.subr.mxu0 %v4960_v10 }
 0x454   : > { %4269 = vmatmul.mubr.msk.f32.vlgmr.msra.gmra.mrb[10].mxu0 %vm662_vm2, %v1399_v11 }
 0x455   : > { %4278 = vmatprep.mubr.msk.f32.mxu0 %vm4961_vm1, %v4960_v10 }
 0x464   : > { %v1004_v12 = vpop.xlane.xlu1 %1003 }
 0x465   : > { %4595 = vrcp.f32 %v1004_v12 }
 0x468   : > { %v1557_v15 = vpop.permute.xlu1 %1556 }
 0x469   : > { %4277 = vmatpush3.xpose.msk.msra.mxu0 %vm662_vm2, %v1557_v15 }
 0x46a   : > { %4286 = vmatprep.subr.mxu0 %v4960_v10 }
 0x46c   : > { %v1555_v16 = vpop.permute.xlu1 %1554 }
 0x46d   : > { %4279 = vmatmul.mubr.msk.f32.vlgmr.msra.gmra.mrb[12].mxu0 %vm662_vm2, %v1555_v16 }
 0x46e   : > { %4288 = vmatprep.mubr.msk.f32.mxu0 %vm4961_vm1, %v4960_v10 }
 0x46f   : > { %v4596_v22 = vpop.eup %4595 }
 0x470   : > { %v1013_v23 = vmul.f32 %v4596_v22, %v4588_v60 }
 0x472   : > { %4254 = vmatmul.mubr.msk.f32.vlgmr.msra.gmra.mrb[8].mxu1 %vm662_vm2, %v1013_v23 }
 0x473   : > { %4262 = vmatpush3.xpose.msk.msra.mxu1 %vm662_vm2, %v1323_v13  ;;  %4263 = vmatprep.mubr.msk.f32.mxu1 %vm4961_vm1, %v4960_v10 }
 0x474   : > { %4271 = vmatprep.subr.mxu1 %v4960_v10 }
 0x476   : > { %4264 = vmatmul.mubr.msk.f32.vlgmr.msra.gmra.mrb[10].mxu1 %vm662_vm2, %v1321_v20 }
 0x477   : > { %4272 = vmatpush3.xpose.msk.msra.mxu1 %vm662_vm2, %v1479_v25  ;;  %4273 = vmatprep.mubr.msk.f32.mxu1 %vm4961_vm1, %v4960_v10 }
 0x478   : > { %4281 = vmatprep.subr.mxu1 %v4960_v10 }
 0x47a   : > { %4274 = vmatmul.mubr.msk.f32.vlgmr.msra.gmra.mrb[12].mxu1 %vm662_vm2, %v1477_v28 }
 0x47b   : > { %4283 = vmatprep.mubr.msk.f32.mxu1 %vm4961_vm1, %v4960_v10 }
 0x50c   : > { %v5461_v29 = vpop.f32.mrb[6].mxu1 }
 0x50d   : > { %v4245_v30 = vpop.f32.mrb[7].mxu1 }
 0x51c   : > { %v5463_v31 = vpop.f32.mrb[6].mxu0 }
 0x51d   : > { %v4250_v32 = vpop.f32.mrb[7].mxu0 }
 0x520   : > { %v5465_v33 = vpop.f32.mrb[8].mxu0 }
 0x521   : > { %v4260_v34 = vpop.f32.mrb[9].mxu0 }
 0x527   : > { %v1472_v35 = vpop.f32.mrb[10].mxu0 }
 0x528   : > { %v4270_v36 = vpop.f32.mrb[11].mxu0  ;;  %v1635_v37 = vsel %vm662_vm2, %v1472_v35, -inf }
 0x529   : > { %1636 = vmax.xlane.f32.xlu1 %v1635_v37 }
 0x53a   : > { %1676 = vrot.lane.b32.xlu1 %v5357_v14, %s4966_s11 }
 0x53e   : > { %1828 = vrot.lane.b32.xlu1 %v5362_v18, %s4966_s11 }
 0x540   : > { %v1628_v38 = vpop.f32.mrb[12].mxu0 }
 0x541   : > { %v4280_v39 = vpop.f32.mrb[13].mxu0  ;;  %v1641_v48 = vsel %vm662_vm2, %v1628_v38, -inf }
 0x542   : > { %1904 = vrot.lane.b32.xlu1 %v5364_v19, %s4966_s11 }
 0x545   : > { %v5471_v40 = vpop.f32.mrb[8].mxu1 }
 0x546   : > { %2060 = vrot.lane.b32.xlu1 %v5360_v17, %s4967_s24  ;;  %v4255_v41 = vpop.f32.mrb[9].mxu1 }
 0x549   : > { %v1394_v42 = vpop.f32.mrb[10].mxu1 }
 0x54a   : > { %v4265_v43 = vpop.f32.mrb[11].mxu1  ;;  %v1632_v44 = vsel %vm662_vm2, %v1394_v42, -inf }
 0x54b   : > { %1633 = vmax.xlane.f32.xlu0 %v1632_v44 }
 0x54d   : > { %v1550_v45 = vpop.f32.mrb[12].mxu1 }
 0x54e   : > { %v4275_v46 = vpop.f32.mrb[13].mxu1  ;;  %v1638_v47 = vsel %vm662_vm2, %v1550_v45, -inf }
 0x54f   : > { %1639 = vmax.xlane.f32.xlu0 %v1638_v47 }
 0x553   : > { %1642 = vmax.xlane.f32.xlu0 %v1641_v48 }
 0x569   : > { %1752 = vrot.lane.b32.xlu0 %v5360_v17, %s4966_s11 }
 0x56d   : > { %1982 = vrot.lane.b32.xlu0 %v5357_v14, %s4967_s24 }
 0x5b6   : > { %v1637_v49 = vpop.xlane.xlu1 %1636 }
 0x5b7   : > { %v1645_v50 = vsub.f32 %v1472_v35, %v1637_v49 }
 0x5b9   : > { %v1650_v51 = vmul.f32 1.442695, %v1645_v50 }
 0x5ba   : > { %v1677_v52 = vpop.permute.xlu1 %1676 }
 0x5bb   : > { %4597 = vpow2.f32 %v1650_v51  ;;  %4282 = vmatpush3.msra.mxu1 %v1677_v52 }
 0x5bc   : > { %4291 = vmatprep.subr.mxu1 %v4960_v10 }
 0x5be   : > { %v1829_v9 = vpop.permute.xlu1 %1828 }
 0x5c2   : > { %v1905_v13 = vpop.permute.xlu1 %1904 }
 0x5c5   : > { %v4598_v53 = vpop.eup %4597 }
 0x5c6   : > { %v1659_v54 = vsel %vm662_vm2, %v4598_v53, 0.0  ;;  %v2061_v15 = vpop.permute.xlu1 %2060 }
 0x5c7   : > { %1660 = vadd.xlane.f32.xlu0 %v1659_v54 }
 0x5d8   : > { %v1634_v55 = vpop.xlane.xlu0 %1633 }
 0x5d9   : > { %v1644_v56 = vsub.f32 %v1394_v42, %v1634_v55 }
 0x5db   : > { %v1648_v57 = vmul.f32 1.442695, %v1644_v56 }
 0x5dc   : > { %v1640_v58 = vpop.xlane.xlu0 %1639 }
 0x5dd   : > { %4599 = vpow2.f32 %v1648_v57  ;;  %v1646_v59 = vsub.f32 %v1550_v45, %v1640_v58 }
 0x5df   : > { %v1652_v60 = vmul.f32 1.442695, %v1646_v59 }
 0x5e0   : > { %v1643_v61 = vpop.xlane.xlu0 %1642 }
 0x5e1   : > { %4601 = vpow2.f32 %v1652_v60  ;;  %v1647_v62 = vsub.f32 %v1628_v38, %v1643_v61 }
 0x5e3   : > { %v1654_v63 = vmul.f32 1.442695, %v1647_v62 }
 0x5e4   : > { %v1753_v0 = vpop.permute.xlu0 %1752 }
 0x5e5   : > { %4603 = vpow2.f32 %v1654_v63  ;;  %4287 = vmatpush3.msra.mxu0 %v1753_v0 }
 0x5e6   : > { %4296 = vmatprep.subr.mxu0 %v4960_v10 }
 0x5e7   : > { %v4600_v1 = vpop.eup %4599 }
 0x5e8   : > { %v1656_v2 = vsel %vm662_vm2, %v4600_v1, 0.0  ;;  %v1983_v7 = vpop.permute.xlu0 %1982 }
 0x5e9   : > { %1657 = vadd.xlane.f32.xlu1 %v1656_v2 }
 0x5eb   : > { %v4602_v3 = vpop.eup %4601 }
 0x5ec   : > { %v1662_v4 = vsel %vm662_vm2, %v4602_v3, 0.0 }
 0x5ed   : > { %1663 = vadd.xlane.f32.xlu1 %v1662_v4 }
 0x5ef   : > { %v4604_v5 = vpop.eup %4603 }
 0x5f0   : > { %v1665_v6 = vsel %vm662_vm2, %v4604_v5, 0.0 }
 0x5f1   : > { %1666 = vadd.xlane.f32.xlu0 %v1665_v6 }
 0x5fe   : > { %2058 = vrot.lane.b32.xlu1 %v5380_v24, %s4968_s20 }
 0x602   : > { %2216 = vrot.lane.b32.xlu1 %v5364_v19, %s4967_s24 }
 0x606   : > { %2214 = vrot.lane.b32.xlu1 %v5393_v27, %s4968_s20 }
 0x607   : > { %1980 = vrot.lane.b32.xlu0 %v5372_v21, %s4968_s20 }
 0x60a   : > { %2336 = vrot.lane.b32.xlu1 %v5357_v14, %s4969_s12 }
 0x60b   : > { %2138 = vrot.lane.b32.xlu0 %v5362_v18, %s4967_s24 }
 0x60e   : > { %2488 = vrot.lane.b32.xlu1 %v5362_v18, %s4969_s12 }
 0x60f   : > { %2136 = vrot.lane.b32.xlu0 %v5390_v26, %s4968_s20  ;;  %s5826_s20 = sld [smem:[#allocation21_spill]] }
 0x612   : > { %2564 = vrot.lane.b32.xlu1 %v5364_v19, %s4969_s12 }
 0x613   : > { %2412 = vrot.lane.b32.xlu0 %v5360_v17, %s4969_s12  ;;  %s5830_s12 = sld [smem:[#allocation25_spill]] }
 0x654   : > { %v1661_v8 = vpop.xlane.xlu0 %1660 }
 0x655   : > { %4605 = vrcp.f32 %v1661_v8 }
 0x65f   : > { %v4606_v11 = vpop.eup %4605 }
 0x660   : > { %v1671_v12 = vmul.f32 %v4606_v11, %v4598_v53 }
 0x662   : > { %4289 = vmatmul.mubr.msk.f32.vlgmr.msra.gmra.mrb[14].mxu0 %vm662_vm2, %v1671_v12 }
 0x663   : > { %4297 = vmatpush3.msra.mxu0 %v1905_v13  ;;  %4298 = vmatprep.mubr.msk.f32.mxu0 %vm4961_vm1, %v4960_v10 }
 0x664   : > { %4306 = vmatprep.subr.mxu0 %v4960_v10 }
 0x676   : > { %v1658_v16 = vpop.xlane.xlu1 %1657 }
 0x677   : > { %4607 = vrcp.f32 %v1658_v16 }
 0x67a   : > { %v1664_v20 = vpop.xlane.xlu1 %1663 }
 0x67b   : > { %4609 = vrcp.f32 %v1664_v20 }
 0x67e   : > { %v1667_v22 = vpop.xlane.xlu0 %1666  ;;  %v2059_v25 = vpop.permute.xlu1 %2058 }
 0x67f   : > { %4611 = vrcp.f32 %v1667_v22 }
 0x681   : > { %v4608_v23 = vpop.eup %4607 }
 0x682   : > { %v1669_v28 = vmul.f32 %v4608_v23, %v4600_v1  ;;  %v1981_v30 = vpop.permute.xlu0 %1980  ;;  %v2217_v35 = vpop.permute.xlu1 %2216 }
 0x684   : > { %4284 = vmatmul.mubr.msk.f32.vlgmr.msra.gmra.mrb[14].mxu1 %vm662_vm2, %v1669_v28 }
 0x685   : > { %v4610_v32 = vpop.eup %4609  ;;  %4292 = vmatpush3.msra.mxu1 %v1829_v9  ;;  %4293 = vmatprep.mubr.msk.f32.mxu1 %vm4961_vm1, %v4960_v10 }
 0x686   : > { %v1673_v34 = vmul.f32 %v4610_v32, %v4602_v3  ;;  %4301 = vmatprep.subr.mxu1 %v4960_v10  ;;  %v2139_v36 = vpop.permute.xlu0 %2138  ;;  %v2215_v39 = vpop.permute.xlu1 %2214 }
 0x688   : > { %4294 = vmatmul.mubr.msk.f32.vlgmr.msra.gmra.mrb[16].mxu1 %vm662_vm2, %v1673_v34 }
 0x689   : > { %v4612_v37 = vpop.eup %4611  ;;  %4303 = vmatprep.mubr.msk.f32.mxu1 %vm4961_vm1, %v4960_v10 }
 0x68a   : > { %v1675_v38 = vmul.f32 %v4612_v37, %v4604_v5  ;;  %v2137_v41 = vpop.permute.xlu0 %2136  ;;  %v2337_v42 = vpop.permute.xlu1 %2336 }
 0x68c   : > { %4302 = vmatpush3.xpose.msk.msra.mxu1 %vm662_vm2, %v1983_v7  ;;  %4299 = vmatmul.mubr.msk.f32.vlgmr.msra.gmra.mrb[16].mxu0 %vm662_vm2, %v1675_v38 }
 0x68d   : > { %4307 = vmatpush3.xpose.msk.msra.mxu0 %vm662_vm2, %v2061_v15  ;;  %4311 = vmatprep.subr.mxu1 %v4960_v10 }
 0x68e   : > { %4308 = vmatprep.mubr.msk.f32.mxu0 %vm4961_vm1, %v4960_v10  ;;  %4316 = vmatprep.subr.mxu0 %v4960_v10  ;;  %v2413_v43 = vpop.permute.xlu0 %2412  ;;  %v2489_v0 = vpop.permute.xlu1 %2488 }
 0x68f   : > { %4304 = vmatmul.mubr.msk.f32.vlgmr.msra.gmra.mrb[18].mxu1 %vm662_vm2, %v1981_v30 }
 0x690   : > { %4312 = vmatpush3.xpose.msk.msra.mxu1 %vm662_vm2, %v2139_v36  ;;  %4309 = vmatmul.mubr.msk.f32.vlgmr.msra.gmra.mrb[18].mxu0 %vm662_vm2, %v2059_v25 }
 0x691   : > { %4317 = vmatpush3.xpose.msk.msra.mxu0 %vm662_vm2, %v2217_v35  ;;  %4313 = vmatprep.mubr.msk.f32.mxu1 %vm4961_vm1, %v4960_v10 }
 0x692   : > { %4321 = vmatprep.subr.mxu1 %v4960_v10  ;;  %4318 = vmatprep.mubr.msk.f32.mxu0 %vm4961_vm1, %v4960_v10  ;;  %v2565_v1 = vpop.permute.xlu1 %2564 }
 0x693   : > { %4314 = vmatmul.mubr.msk.f32.vlgmr.msra.gmra.mrb[20].mxu1 %vm662_vm2, %v2137_v41  ;;  %4326 = vmatprep.subr.mxu0 %v4960_v10 }
 0x694   : > { %4322 = vmatpush3.msra.mxu1 %v2337_v42  ;;  %4319 = vmatmul.mubr.msk.f32.vlgmr.msra.gmra.mrb[20].mxu0 %vm662_vm2, %v2215_v39 }
 0x695   : > { %4327 = vmatpush3.msra.mxu0 %v2413_v43  ;;  %4323 = vmatprep.mubr.msk.f32.mxu1 %vm4961_vm1, %v4960_v10 }
 0x696   : > { %4331 = vmatprep.subr.mxu1 %v4960_v10  ;;  %4328 = vmatprep.mubr.msk.f32.mxu0 %vm4961_vm1, %v4960_v10 }
 0x697   : > { %4336 = vmatprep.subr.mxu0 %v4960_v10 }
 0x735   : > { %v5535_v44 = vpop.f32.mrb[14].mxu0 }
 0x736   : > { %v4290_v45 = vpop.f32.mrb[15].mxu0 }
 0x757   : > { %v5537_v46 = vpop.f32.mrb[14].mxu1 }
 0x758   : > { %v4285_v47 = vpop.f32.mrb[15].mxu1 }
 0x75b   : > { %v5539_v48 = vpop.f32.mrb[16].mxu1 }
 0x75c   : > { %v4295_v49 = vpop.f32.mrb[17].mxu1 }
 0x75f   : > { %v5541_v50 = vpop.f32.mrb[16].mxu0 }
 0x760   : > { %v4300_v51 = vpop.f32.mrb[17].mxu0 }
 0x762   : > { %v2054_v52 = vpop.f32.mrb[18].mxu1 }
 0x763   : > { %v4305_v53 = vpop.f32.mrb[19].mxu1  ;;  %v2132_v54 = vpop.f32.mrb[18].mxu0  ;;  %v2292_v55 = vsel %vm662_vm2, %v2054_v52, -inf }
 0x764   : > { %2293 = vmax.xlane.f32.xlu0 %v2292_v55  ;;  %v4310_v56 = vpop.f32.mrb[19].mxu0  ;;  %v2295_v57 = vsel %vm662_vm2, %v2132_v54, -inf }
 0x765   : > { %2296 = vmax.xlane.f32.xlu1 %v2295_v57 }
 0x766   : > { %v2210_v58 = vpop.f32.mrb[20].mxu1 }
 0x767   : > { %v4315_v59 = vpop.f32.mrb[21].mxu1  ;;  %v2288_v60 = vpop.f32.mrb[20].mxu0  ;;  %v2298_v61 = vsel %vm662_vm2, %v2210_v58, -inf }
 0x768   : > { %2299 = vmax.xlane.f32.xlu0 %v2298_v61  ;;  %v4320_v62 = vpop.f32.mrb[21].mxu0  ;;  %v2301_v63 = vsel %vm662_vm2, %v2288_v60, -inf }
 0x76c   : > { %2302 = vmax.xlane.f32.xlu0 %v2301_v63 }
 0x776   : > { %2720 = vrot.lane.b32.xlu1 %v5360_v17, %s4970_s21 }
 0x782   : > { %2642 = vrot.lane.b32.xlu0 %v5357_v14, %s4970_s21 }
 0x7f1   : > { %v2294_v2 = vpop.xlane.xlu0 %2293 }
 0x7f2   : > { %v2304_v3 = vsub.f32 %v2054_v52, %v2294_v2  ;;  %v2297_v4 = vpop.xlane.xlu1 %2296 }
 0x7f3   : > { %v2305_v5 = vsub.f32 %v2132_v54, %v2297_v4 }
 0x7f4   : > { %v2308_v6 = vmul.f32 1.442695, %v2304_v3 }
 0x7f5   : > { %v2310_v7 = vmul.f32 1.442695, %v2305_v5  ;;  %v2300_v13 = vpop.xlane.xlu0 %2299 }
 0x7f6   : > { %4613 = vpow2.f32 %v2308_v6  ;;  %v2306_v16 = vsub.f32 %v2210_v58, %v2300_v13 }
 0x7f7   : > { %4615 = vpow2.f32 %v2310_v7 }
 0x7f8   : > { %v2312_v22 = vmul.f32 1.442695, %v2306_v16 }
 0x7f9   : > { %v2303_v15 = vpop.xlane.xlu0 %2302 }
 0x7fa   : > { %v2307_v20 = vsub.f32 %v2288_v60, %v2303_v15  ;;  %4617 = vpow2.f32 %v2312_v22 }
 0x7fc   : > { %v2314_v23 = vmul.f32 1.442695, %v2307_v20 }
 0x7fe   : > { %4619 = vpow2.f32 %v2314_v23 }
 0x800   : > { %v4614_v8 = vpop.eup %4613 }
 0x801   : > { %v4616_v9 = vpop.eup %4615  ;;  %v2316_v11 = vsel %vm662_vm2, %v4614_v8, 0.0 }
 0x802   : > { %2317 = vadd.xlane.f32.xlu1 %v2316_v11  ;;  %v2319_v12 = vsel %vm662_vm2, %v4616_v9, 0.0 }
 0x803   : > { %2320 = vadd.xlane.f32.xlu0 %v2319_v12 }
 0x804   : > { %v4618_v25 = vpop.eup %4617 }
 0x805   : > { %v2322_v30 = vsel %vm662_vm2, %v4618_v25, 0.0 }
 0x808   : > { %v4620_v28 = vpop.eup %4619 }
 0x809   : > { %v2325_v32 = vsel %vm662_vm2, %v4620_v28, 0.0 }
 0x813   : > { %2718 = vrot.lane.b32.xlu1 %v5380_v24, %s4971_s15  ;;  %v2643_v24 = vpop.permute.xlu0 %2642 }
 0x819   : > { %2640 = vrot.lane.b32.xlu0 %v5372_v21, %s4971_s15  ;;  %v2721_v21 = vpop.permute.xlu1 %2720 }
 0x837   : > { %2323 = vadd.xlane.f32.xlu1 %v2322_v30 }
 0x838   : > { %2326 = vadd.xlane.f32.xlu0 %v2325_v32 }
 0x848   : > { %2876 = vrot.lane.b32.xlu1 %v5364_v19, %s4970_s21 }
 0x84c   : > { %2874 = vrot.lane.b32.xlu1 %v5393_v27, %s4971_s15 }
 0x84e   : > { %2798 = vrot.lane.b32.xlu0 %v5362_v18, %s4970_s21  ;;  %s5828_s21 = sld [smem:[#allocation23_spill]] }
 0x852   : > { %2796 = vrot.lane.b32.xlu0 %v5390_v26, %s4971_s15  ;;  %s4976_s15 = smov [#allocation14]  }
 0x88f   : > { %v2318_v34 = vpop.xlane.xlu1 %2317 }
 0x890   : > { %4621 = vrcp.f32 %v2318_v34  ;;  %v2321_v35 = vpop.xlane.xlu0 %2320 }
 0x891   : > { %4623 = vrcp.f32 %v2321_v35 }
 0x893   : > { %v2719_v26 = vpop.permute.xlu1 %2718 }
 0x894   : > { %v2641_v27 = vpop.permute.xlu0 %2640 }
 0x89a   : > { %v4622_v36 = vpop.eup %4621 }
 0x89b   : > { %v4624_v37 = vpop.eup %4623  ;;  %v2329_v38 = vmul.f32 %v4622_v36, %v4614_v8 }
 0x89c   : > { %v2331_v39 = vmul.f32 %v4624_v37, %v4616_v9 }
 0x89d   : > { %4324 = vmatmul.mubr.msk.f32.vlgmr.msra.gmra.mrb[22].mxu1 %vm662_vm2, %v2329_v38 }
 0x89e   : > { %4332 = vmatpush3.msra.mxu1 %v2489_v0  ;;  %4329 = vmatmul.mubr.msk.f32.vlgmr.msra.gmra.mrb[22].mxu0 %vm662_vm2, %v2331_v39 }
 0x89f   : > { %4337 = vmatpush3.msra.mxu0 %v2565_v1  ;;  %4333 = vmatprep.mubr.msk.f32.mxu1 %vm4961_vm1, %v4960_v10 }
 0x8a0   : > { %4341 = vmatprep.subr.mxu1 %v4960_v10  ;;  %4338 = vmatprep.mubr.msk.f32.mxu0 %vm4961_vm1, %v4960_v10 }
 0x8a1   : > { %4346 = vmatprep.subr.mxu0 %v4960_v10 }
 0x8c4   : > { %v2324_v41 = vpop.xlane.xlu1 %2323 }
 0x8c5   : > { %4625 = vrcp.f32 %v2324_v41  ;;  %v2327_v42 = vpop.xlane.xlu0 %2326 }
 0x8c6   : > { %4627 = vrcp.f32 %v2327_v42 }
 0x8c8   : > { %v2877_v52 = vpop.permute.xlu1 %2876 }
 0x8c9   : > { %v2799_v51 = vpop.permute.xlu0 %2798 }
 0x8cc   : > { %v2875_v54 = vpop.permute.xlu1 %2874 }
 0x8cd   : > { %v2797_v53 = vpop.permute.xlu0 %2796 }
 0x8cf   : > { %v4626_v43 = vpop.eup %4625 }
 0x8d0   : > { %v4628_v45 = vpop.eup %4627  ;;  %v2333_v47 = vmul.f32 %v4626_v43, %v4618_v25 }
 0x8d1   : > { %v2335_v49 = vmul.f32 %v4628_v45, %v4620_v28 }
 0x8d2   : > { %4334 = vmatmul.mubr.msk.f32.vlgmr.msra.gmra.mrb[24].mxu1 %vm662_vm2, %v2333_v47 }
 0x8d3   : > { %4342 = vmatpush3.xpose.msk.msra.mxu1 %vm662_vm2, %v2643_v24  ;;  %4339 = vmatmul.mubr.msk.f32.vlgmr.msra.gmra.mrb[24].mxu0 %vm662_vm2, %v2335_v49 }
 0x8d4   : > { %4347 = vmatpush3.xpose.msk.msra.mxu0 %vm662_vm2, %v2721_v21  ;;  %4343 = vmatprep.mubr.msk.f32.mxu1 %vm4961_vm1, %v4960_v10 }
 0x8d5   : > { %4351 = vmatprep.subr.mxu1 %v4960_v10  ;;  %4348 = vmatprep.mubr.msk.f32.mxu0 %vm4961_vm1, %v4960_v10 }
 0x8d6   : > { %4344 = vmatmul.mubr.msk.f32.vlgmr.msra.gmra.mrb[26].mxu1 %vm662_vm2, %v2641_v27  ;;  %4356 = vmatprep.subr.mxu0 %v4960_v10 }
 0x8d7   : > { %4352 = vmatpush3.xpose.msk.msra.mxu1 %vm662_vm2, %v2799_v51  ;;  %4349 = vmatmul.mubr.msk.f32.vlgmr.msra.gmra.mrb[26].mxu0 %vm662_vm2, %v2719_v26 }
 0x8d8   : > { %4357 = vmatpush3.xpose.msk.msra.mxu0 %vm662_vm2, %v2877_v52  ;;  %4353 = vmatprep.mubr.msk.f32.mxu1 %vm4961_vm1, %v4960_v10  ;;  %v3362_v52 = vld [vmem:[#allocation7] sm:$0xff] }
 0x8d9   : > { %4358 = vmatprep.mubr.msk.f32.mxu0 %vm4961_vm1, %v4960_v10  ;;  %4361 = vmatprep.subr.mxu1 %v4960_v10 }
 0x8da   : > { %4354 = vmatmul.mubr.msk.f32.vlgmr.msra.gmra.mrb[28].mxu1 %vm662_vm2, %v2797_v53  ;;  %4366 = vmatprep.subr.mxu0 %v4960_v10  ;;  %v3363_v53 = vld [vmem:[#allocation7 + $0x8] sm:$0xff] }
 0x8db   : > { %4359 = vmatmul.mubr.msk.f32.vlgmr.msra.gmra.mrb[28].mxu0 %vm662_vm2, %v2875_v54  ;;  %4363 = vmatprep.mubr.msk.f32.mxu1 %vm4961_vm1, %v4960_v10  ;;  %v3364_v54 = vld [vmem:[#allocation7 + $0x10] sm:$0xff] }
 0x8dc   : > { %4368 = vmatprep.mubr.msk.f32.mxu0 %vm4961_vm1, %v4960_v10 }
 0x970   : > { %v5597_v55 = vpop.f32.mrb[22].mxu1 }
 0x971   : > { %v4325_v56 = vpop.f32.mrb[23].mxu1  ;;  %v2484_v57 = vpop.f32.mrb[22].mxu0 }
 0x972   : > { %v4330_v58 = vpop.f32.mrb[23].mxu0  ;;  %v3365_v56 = vld [vmem:[#allocation7 + $0x18] sm:$0xff] }
 0x9a5   : > { %v5599_v59 = vpop.f32.mrb[24].mxu1 }
 0x9a6   : > { %v4335_v60 = vpop.f32.mrb[25].mxu1  ;;  %v2636_v61 = vpop.f32.mrb[24].mxu0 }
 0x9a7   : > { %v4340_v62 = vpop.f32.mrb[25].mxu0 }
 0x9a9   : > { %v2714_v63 = vpop.f32.mrb[26].mxu1 }
 0x9aa   : > { %v4345_v0 = vpop.f32.mrb[27].mxu1  ;;  %v2792_v1 = vpop.f32.mrb[26].mxu0  ;;  %v2952_v2 = vsel %vm662_vm2, %v2714_v63, -inf }
 0x9ab   : > { %2953 = vmax.xlane.f32.xlu0 %v2952_v2  ;;  %v4350_v3 = vpop.f32.mrb[27].mxu0  ;;  %v2955_v4 = vsel %vm662_vm2, %v2792_v1, -inf }
 0x9ac   : > { %2956 = vmax.xlane.f32.xlu1 %v2955_v4 }
 0x9ad   : > { %v2870_v5 = vpop.f32.mrb[28].mxu1 }
 0x9ae   : > { %v4355_v6 = vpop.f32.mrb[29].mxu1  ;;  %v2948_v7 = vpop.f32.mrb[28].mxu0  ;;  %v2958_v8 = vsel %vm662_vm2, %v2870_v5, -inf }
 0x9af   : > { %2959 = vmax.xlane.f32.xlu0 %v2958_v8  ;;  %v4360_v9 = vpop.f32.mrb[29].mxu0  ;;  %v2961_v11 = vsel %vm662_vm2, %v2948_v7, -inf }
 0x9b3   : > { %2962 = vmax.xlane.f32.xlu0 %v2961_v11 }
 0x9bd   : > { %2996 = vrot.lane.b32.xlu1 %v5357_v14, %s4972_s22 }
 0xa38   : > { %v2954_v12 = vpop.xlane.xlu0 %2953 }
 0xa39   : > { %v2964_v13 = vsub.f32 %v2714_v63, %v2954_v12  ;;  %v2957_v15 = vpop.xlane.xlu1 %2956 }
 0xa3a   : > { %v2965_v16 = vsub.f32 %v2792_v1, %v2957_v15 }
 0xa3b   : > { %v2968_v20 = vmul.f32 1.442695, %v2964_v13 }
 0xa3c   : > { %v2970_v22 = vmul.f32 1.442695, %v2965_v16  ;;  %v2960_v23 = vpop.xlane.xlu0 %2959 }
 0xa3d   : > { %4629 = vpow2.f32 %v2968_v20  ;;  %v2966_v25 = vsub.f32 %v2870_v5, %v2960_v23  ;;  %v2997_v28 = vpop.permute.xlu1 %2996 }
 0xa3e   : > { %4631 = vpow2.f32 %v2970_v22  ;;  %4362 = vmatpush3.msra.mxu1 %v2997_v28 }
 0xa3f   : > { %v2972_v30 = vmul.f32 1.442695, %v2966_v25  ;;  %4371 = vmatprep.subr.mxu1 %v4960_v10 }
 0xa40   : > { %v2963_v32 = vpop.xlane.xlu0 %2962 }
 0xa41   : > { %4633 = vpow2.f32 %v2972_v30  ;;  %v2967_v21 = vsub.f32 %v2948_v7, %v2963_v32 }
 0xa43   : > { %v2974_v24 = vmul.f32 1.442695, %v2967_v21 }
 0xa45   : > { %4635 = vpow2.f32 %v2974_v24 }
 0xa47   : > { %v4630_v14 = vpop.eup %4629 }
 0xa48   : > { %v4632_v34 = vpop.eup %4631  ;;  %v2976_v35 = vsel %vm662_vm2, %v4630_v14, 0.0 }
 0xa49   : > { %2977 = vadd.xlane.f32.xlu1 %v2976_v35  ;;  %v2979_v36 = vsel %vm662_vm2, %v4632_v34, 0.0 }
 0xa4a   : > { %2980 = vadd.xlane.f32.xlu0 %v2979_v36  ;;  %v4669_v36 = vld [vmem:[%s5322_s23 + $0x8] sm:$0xff] }
 0xa4b   : > { %v4634_v37 = vpop.eup %4633 }
 0xa4c   : > { %v2982_v38 = vsel %vm662_vm2, %v4634_v37, 0.0 }
 0xa4d   : > { %2983 = vadd.xlane.f32.xlu1 %v2982_v38 }
 0xa4f   : > { %v4636_v39 = vpop.eup %4635 }
 0xa50   : > { %v2985_v26 = vsel %vm662_vm2, %v4636_v39, 0.0 }
 0xa51   : > { %2986 = vadd.xlane.f32.xlu0 %v2985_v26 }
 0xa5e   : > { %3148 = vrot.lane.b32.xlu1 %v5362_v18, %s4972_s22 }
 0xa62   : > { %3224 = vrot.lane.b32.xlu1 %v5364_v19, %s4972_s22 }
 0xa66   : > { %3306 = vrot.lane.b32.xlu1 %v5535_v44, %s4973_s13 }
 0xa67   : > { %3072 = vrot.lane.b32.xlu0 %v5360_v17, %s4972_s22  ;;  %s4875_s22 = sshll.u32 %s4976_s15, 4  ;;  %s4876_s22 = int_to_ptr.vmem [resolvable:$false] %s4875_s22 }
 0xa6a   : > { %3322 = vrot.lane.b32.xlu1 %v2484_v57, %s4974_s10  ;;  %v4435_v57 = vpack.c.bf16 %v3365_v56, %v3364_v54 }
 0xa6b   : > { %3304 = vrot.lane.b32.xlu0 %v5537_v46, %s4973_s13 }
 0xa6e   : > { %3310 = vrot.lane.b32.xlu1 %v5541_v50, %s4973_s13 }
 0xa6f   : > { %3320 = vrot.lane.b32.xlu0 %v5597_v55, %s4974_s10  ;;  %v4431_v55 = vpack.c.bf16 %v3363_v53, %v3362_v52 }
 0xa72   : > { %3326 = vrot.lane.b32.xlu1 %v2636_v61, %s4974_s10 }
 0xa73   : > { %3308 = vrot.lane.b32.xlu0 %v5539_v48, %s4973_s13 }
 0xa77   : > { %3324 = vrot.lane.b32.xlu0 %v5599_v59, %s4974_s10  ;;  %s5829_s10 = sld [smem:[#allocation24_spill]] }
 0xad6   : > { %v2978_v18 = vpop.xlane.xlu1 %2977 }
 0xad7   : > { %4637 = vrcp.f32 %v2978_v18  ;;  %v2981_v19 = vpop.xlane.xlu0 %2980 }
 0xad8   : > { %4639 = vrcp.f32 %v2981_v19 }
 0xada   : > { %v2984_v17 = vpop.xlane.xlu1 %2983 }
 0xadb   : > { %4641 = vrcp.f32 %v2984_v17 }
 0xade   : > { %v2987_v44 = vpop.xlane.xlu0 %2986  ;;  %v3149_v27 = vpop.permute.xlu1 %3148 }
 0xadf   : > { %4643 = vrcp.f32 %v2987_v44 }
 0xae1   : > { %v4638_v46 = vpop.eup %4637 }
 0xae2   : > { %v4640_v41 = vpop.eup %4639  ;;  %v2989_v50 = vmul.f32 %v4638_v46, %v4630_v14  ;;  %v3073_v42 = vpop.permute.xlu0 %3072 }
 0xae3   : > { %v2991_v43 = vmul.f32 %v4640_v41, %v4632_v34  ;;  %4367 = vmatpush3.msra.mxu0 %v3073_v42  ;;  %v3225_v45 = vpop.permute.xlu1 %3224 }
 0xae4   : > { %4364 = vmatmul.mubr.msk.f32.vlgmr.msra.gmra.mrb[30].mxu1 %vm662_vm2, %v2989_v50  ;;  %4376 = vmatprep.subr.mxu0 %v4960_v10  ;;  %v4672_v50 = vld [vmem:[%s5322_s23 + $0x18] sm:$0xff] }
 0xae5   : > { %v4642_v48 = vpop.eup %4641  ;;  %4372 = vmatpush3.msra.mxu1 %v3149_v27  ;;  %4369 = vmatmul.mubr.msk.f32.vlgmr.msra.gmra.mrb[30].mxu0 %vm662_vm2, %v2991_v43  ;;  %v4671_v27 = vld [vmem:[%s5322_s23 + $0x10] sm:$0xff] }
 0xae6   : > { %v2993_v47 = vmul.f32 %v4642_v48, %v4634_v37  ;;  %4377 = vmatpush3.msra.mxu0 %v3225_v45  ;;  %4373 = vmatprep.mubr.msk.f32.mxu1 %vm4961_vm1, %v4960_v10  ;;  %v3305_v1 = vpop.permute.xlu0 %3304 }
 0xae7   : > { %4378 = vmatprep.mubr.msk.f32.mxu0 %vm4961_vm1, %v4960_v10  ;;  %4432 = vmatprep.subr.bf16.mxu1 %v4431_v55  ;;  %v3307_v2 = vpop.permute.xlu1 %3306  ;;  %v3348_v9 = vsel %vm662_vm2, %v5461_v29, %v3305_v1 }
 0xae8   : > { %4374 = vmatmul.mubr.msk.f32.vlgmr.msra.gmra.mrb[32].mxu1 %vm662_vm2, %v2993_v47  ;;  %v3349_v11 = vsel %vm662_vm2, %v5463_v31, %v3307_v2  ;;  %v3549_v2 = vld [vmem:[#allocation11] sm:$0xff] }
 0xae9   : > { %v4644_v49 = vpop.eup %4643  ;;  %4434 = vmatpush3.bf16.msra.mxu1 %v4431_v55 }
 0xaea   : > { %v2995_v51 = vmul.f32 %v4644_v49, %v4636_v39  ;;  %4436 = vmatprep.subr.bf16.mxu1 %v4435_v57  ;;  %v3321_v3 = vpop.permute.xlu0 %3320 }
 0xaeb   : > { %v3323_v4 = vpop.permute.xlu1 %3322  ;;  %v3353_v12 = vsel %vm3352_vm3, %v3348_v9, %v3321_v3  ;;  %v3550_v3 = vld [vmem:[#allocation11 + $0x8] sm:$0xff] }
 0xaec   : > { %4379 = vmatmul.mubr.msk.f32.vlgmr.msra.gmra.mrb[32].mxu0 %vm662_vm2, %v2995_v51  ;;  %v3354_v15 = vsel %vm3352_vm3, %v3349_v11, %v3323_v4  ;;  %v4439_v4 = vpack.c.bf16 %v3550_v3, %v3549_v2 }
 0xaed   : > { %4438 = vmatpush3.bf16.msra.mxu1 %v4435_v57 }
 0xaee   : > { %v3309_v5 = vpop.permute.xlu0 %3308  ;;  %4440 = vmatprep.subr.bf16.mxu0 %v4439_v4 }
 0xaef   : > { %v3311_v6 = vpop.permute.xlu1 %3310  ;;  %v3350_v23 = vsel %vm662_vm2, %v5471_v40, %v3309_v5  ;;  %v4085_v40 = vld [vmem:[%s5786_s4] ss:$0 sm:$0xff]  ;;  %v3551_v5 = vld [vmem:[#allocation11 + $0x10] sm:$0xff]  ;;  %4442 = vmatpush3.bf16.msra.mxu0 %v4439_v4 }
 0xaf0   : > { %v3351_v28 = vsel %vm662_vm2, %v5465_v33, %v3311_v6  ;;  %v4670_v33 = vld [vmem:[%s5322_s23] sm:$0xff]  ;;  %s5827_s23 = sld [smem:[#allocation22_spill]] }
 0xaf1   : > { %v3552_v6 = vld [vmem:[#allocation11 + $0x18] sm:$0xff] }
 0xaf2   : > { %v3325_v7 = vpop.permute.xlu0 %3324 }
 0xaf3   : > { %v3327_v8 = vpop.permute.xlu1 %3326  ;;  %v3355_v29 = vsel %vm3352_vm3, %v3350_v23, %v3325_v7  ;;  %v4443_v7 = vpack.c.bf16 %v3552_v6, %v3551_v5 }
 0xaf4   : > { %v3356_v30 = vsel %vm3352_vm3, %v3351_v28, %v3327_v8  ;;  %v4090_v28 = vld [vmem:[#allocation8] ss:$0 sm:$0xff] }
 0xaf5   : > { %4444 = vmatprep.subr.bf16.mxu0 %v4443_v7 }
 0xaf6   : > { %4446 = vmatpush3.bf16.msra.mxu0 %v4443_v7 }
 0xbb7   : > { %v3068_v58 = vpop.f32.mrb[30].mxu1 }
 0xbb8   : > { %3336 = vrot.lane.b32.xlu0 %v3068_v58, %s4975_s1  ;;  %v4365_v10 = vpop.f32.mrb[31].mxu1  ;;  %v3144_v59 = vpop.f32.mrb[30].mxu0 }
 0xbb9   : > { %3338 = vrot.lane.b32.xlu1 %v3144_v59, %s4975_s1  ;;  %v4370_v60 = vpop.f32.mrb[31].mxu0 }
 0xbbb   : > { %v3220_v61 = vpop.f32.mrb[32].mxu1 }
 0xbbc   : > { %3340 = vrot.lane.b32.xlu0 %v3220_v61, %s4975_s1  ;;  %v4375_v62 = vpop.f32.mrb[33].mxu1 }
 0xbbf   : > { %v3296_v63 = vpop.f32.mrb[32].mxu0 }
 0xbc0   : > { %3342 = vrot.lane.b32.xlu1 %v3296_v63, %s4975_s1  ;;  %v4380_v0 = vpop.f32.mrb[33].mxu0  ;;  %s539_s1 = scalar_lea.vmem [#allocation14], %s4024_s16 }
 0xbc1   : > { %s3881_s11 = sshll.u32 %s539_s1, 4  ;;  %s5735_s11 = int_to_ptr.vmem [resolvable:$true] %s3881_s11 }
 0xbc2   : > { %s4871_s16 = scalar_lea.vmem %s5735_s11, 512  ;;  %p4878_p13 = scmp.lt.s32.totalorder %s5735_s11, %s4876_s22 }
 0xbc3   : > { %p4872_p6 = scmp.ne.s32.totalorder %s5735_s11, %s4871_s16 }
 0xbc5   : > { %p4873_p12 = pnand %p4872_p6, %p5831_p9 }
 0xbc7   : > { %p4874_p1 = pneg %p4873_p12 }
 0xc2a   : > { %v3337_v13 = vpop.permute.xlu0 %3336 }
 0xc2b   : > { %v3358_v16 = vsel %vm3357_vm4, %v3353_v12, %v3337_v13  ;;  %v3339_v20 = vpop.permute.xlu1 %3338 }
 0xc2c   : > { %v3359_v22 = vsel %vm3357_vm4, %v3354_v15, %v3339_v20  ;;  %4389 = vmatprep.mubr.msk.f32.mxu1 %vm557_vm0, %v3358_v16 }
 0xc2d   : > { %4390 = vmatmul.mubr.msk.f32.vlgmr.msra.gmra.mrb[34].mxu1 %vm557_vm0, %v3359_v22 }
 0xc2e   : > { %v3341_v31 = vpop.permute.xlu0 %3340 }
 0xc2f   : > { %v3360_v25 = vsel %vm3357_vm4, %v3355_v29, %v3341_v31 }
 0xc30   : > { %4392 = vmatprep.mubr.msk.f32.mxu1 %vm557_vm0, %v3360_v25 }
 0xc32   : > { %v3343_v32 = vpop.permute.xlu1 %3342 }
 0xc33   : > { %v3361_v21 = vsel %vm3357_vm4, %v3356_v30, %v3343_v32 }
 0xc34   : > { %4393 = vmatmul.mubr.msk.f32.gmra.mrb[36].mxu1 %vm557_vm0, %v3361_v21 }
 0xd00   : > { %v4391_v24 = vpop.f32.mrb[34].mxu1 }
 0xd01   : > { %v3457_v14 = vadd.f32 %v4391_v24, %v4085_v40  ;;  %v3451_v34 = vpop.f32.mrb[35].mxu1 }
 0xd02   : > { %v3452_v35 = vadd.f32 %v4085_v40, %v3451_v34 }
 0xd03   : > { %v3471_v37 = vadd.f32 %v4669_v36, %v3457_v14 }
 0xd04   : > { %v3470_v38 = vadd.f32 %v4670_v33, %v3452_v35 }
 0xd05   : > { %v3477_v39 = vsel %vm557_vm0, %v3471_v37, 0.0 }
 0xd06   : > { %3478 = vadd.xlane.f32.xlu1 %v3477_v39  ;;  %v3474_v26 = vsel %vm557_vm0, %v3470_v38, 0.0 }
 0xd07   : > { %v4394_v18 = vpop.f32.mrb[36].mxu1  ;;  %3475 = vadd.xlane.f32.xlu0 %v3474_v26 }
 0xd08   : > { %v3461_v19 = vpop.f32.mrb[37].mxu1  ;;  %v3467_v17 = vadd.f32 %v4394_v18, %v4085_v40 }
 0xd09   : > { %v3462_v44 = vadd.f32 %v4085_v40, %v3461_v19  ;;  %v4091_v40 = vld [vmem:[#allocation10] ss:$0 sm:$0xff] }
 0xd0a   : > { %v3473_v42 = vadd.f32 %v4672_v50, %v3467_v17  ;;  %v3677_v17 = vld [vmem:[%s5826_s20] sm:$0xff] }
 0xd0b   : > { %v3472_v46 = vadd.f32 %v4671_v27, %v3462_v44  ;;  %v3678_v44 = vld [vmem:[%s5826_s20 + $0x8] sm:$0xff] }
 0xd0c   : > { %v3483_v43 = vsel %vm557_vm0, %v3473_v42, 0.0  ;;  %v4447_v27 = vpack.c.bf16 %v3678_v44, %v3677_v17 }
 0xd0d   : > { %v3480_v41 = vsel %vm557_vm0, %v3472_v46, 0.0 }
 0xd0e   : > { %3481 = vadd.xlane.f32.xlu0 %v3480_v41  ;;  %4448 = vmatprep.subr.bf16.mxu1 %v4447_v27  ;;  %v3680_v41 = vld [vmem:[%s5826_s20 + $0x18] sm:$0xff] }
 0xd0f   : > { %4450 = vmatpush3.bf16.msra.mxu1 %v4447_v27 }
 0xd12   : > { %3484 = vadd.xlane.f32.xlu0 %v3483_v43 }
 0xd93   : > { %v3479_v48 = vpop.xlane.xlu1 %3478 }
 0xd94   : > { %v3488_v45 = vmul.f32 0.03125, %v3479_v48  ;;  %v3476_v47 = vpop.xlane.xlu0 %3475 }
 0xd95   : > { %v3487_v49 = vmul.f32 0.03125, %v3476_v47 }
 0xd96   : > { %v3492_v51 = vsub.f32 %v3471_v37, %v3488_v45 }
 0xd97   : > { %v3491_v52 = vsub.f32 %v3470_v38, %v3487_v49 }
 0xd98   : > { %v3496_v53 = vmul.f32 %v3492_v51, %v3492_v51 }
 0xd99   : > { %v3495_v54 = vmul.f32 %v3491_v52, %v3491_v52 }
 0xd9a   : > { %v3502_v55 = vsel %vm557_vm0, %v3496_v53, 0.0 }
 0xd9b   : > { %v3482_v56 = vpop.xlane.xlu0 %3481  ;;  %3503 = vadd.xlane.f32.xlu0 %v3502_v55  ;;  %v3499_v57 = vsel %vm557_vm0, %v3495_v54, 0.0 }
 0xd9c   : > { %v3489_v58 = vmul.f32 0.03125, %v3482_v56  ;;  %3500 = vadd.xlane.f32.xlu1 %v3499_v57 }
 0xd9e   : > { %v3493_v10 = vsub.f32 %v3472_v46, %v3489_v58  ;;  %v3679_v46 = vld [vmem:[%s5826_s20 + $0x10] sm:$0xff] }
 0xd9f   : > { %v3485_v59 = vpop.xlane.xlu0 %3484  ;;  %v4451_v50 = vpack.c.bf16 %v3680_v41, %v3679_v46 }
 0xda0   : > { %v3490_v60 = vmul.f32 0.03125, %v3485_v59  ;;  %v3497_v61 = vmul.f32 %v3493_v10, %v3493_v10 }
 0xda1   : > { %4452 = vmatprep.subr.bf16.mxu1 %v4451_v50 }
 0xda2   : > { %v3494_v62 = vsub.f32 %v3473_v42, %v3490_v60  ;;  %v3505_v63 = vsel %vm557_vm0, %v3497_v61, 0.0  ;;  %4454 = vmatpush3.bf16.msra.mxu1 %v4451_v50  ;;  %v4092_v42 = vld [vmem:[#allocation13] ss:$0 sm:$0xff] }
 0xda3   : > { %3506 = vadd.xlane.f32.xlu1 %v3505_v63 }
 0xda4   : > { %v3498_v0 = vmul.f32 %v3494_v62, %v3494_v62 }
 0xda6   : > { %v3508_v1 = vsel %vm557_vm0, %v3498_v0, 0.0 }
 0xda7   : > { %3509 = vadd.xlane.f32.xlu0 %v3508_v1 }
 0xe28   : > { %v3504_v8 = vpop.xlane.xlu0 %3503 }
 0xe29   : > { %v3512_v9 = vmul.f32 0.03125, %v3504_v8  ;;  %v3501_v11 = vpop.xlane.xlu1 %3500 }
 0xe2a   : > { %v3511_v12 = vmul.f32 0.03125, %v3501_v11 }
 0xe2b   : > { %v3516_v13 = vadd.f32 1e-05, %v3512_v9  ;;  %v4097_v9 = vld [vmem:[%s5827_s23] ss:$0 sm:$0xff] }
 0xe2c   : > { %v3515_v15 = vadd.f32 1e-05, %v3511_v12 }
 0xe2d   : > { %4645 = vrsqrt.f32 %v3516_v13 }
 0xe2e   : > { %4647 = vrsqrt.f32 %v3515_v15 }
 0xe30   : > { %v3507_v16 = vpop.xlane.xlu1 %3506 }
 0xe31   : > { %v3513_v20 = vmul.f32 0.03125, %v3507_v16 }
 0xe33   : > { %v3517_v22 = vadd.f32 1e-05, %v3513_v20 }
 0xe34   : > { %v3510_v23 = vpop.xlane.xlu0 %3509 }
 0xe35   : > { %4649 = vrsqrt.f32 %v3517_v22  ;;  %v3514_v29 = vmul.f32 0.03125, %v3510_v23 }
 0xe37   : > { %v4646_v31 = vpop.eup %4645  ;;  %v3518_v25 = vadd.f32 1e-05, %v3514_v29 }
 0xe38   : > { %v4648_v30 = vpop.eup %4647  ;;  %v3524_v32 = vmul.f32 %v4646_v31, %v3492_v51 }
 0xe39   : > { %4651 = vrsqrt.f32 %v3518_v25  ;;  %v3523_v21 = vmul.f32 %v4648_v30, %v3491_v52 }
 0xe3a   : > { %v3535_v24 = vmul.f32 %v4090_v28, %v3524_v32 }
 0xe3b   : > { %v3534_v14 = vmul.f32 %v4090_v28, %v3523_v21 }
 0xe3c   : > { %v5674_v35 = vadd.f32 %v4091_v40, %v3535_v24 }
 0xe3d   : > { %v5672_v34 = vadd.f32 %v4091_v40, %v3534_v14 }
 0xe3f   : > { %v4650_v36 = vpop.eup %4649  ;;  %4403 = vmatprep.mubr.msk.f32.mxu0 %vm557_vm0, %v5672_v34 }
 0xe40   : > { %4404 = vmatmul.mubr.msk.f32.vlgmr.msra.gmra.mrb[34].mxu0 %vm557_vm0, %v5674_v35  ;;  %v3525_v37 = vmul.f32 %v4650_v36, %v3493_v10 }
 0xe42   : > { %v3536_v33 = vmul.f32 %v4090_v28, %v3525_v37 }
 0xe43   : > { %v4652_v38 = vpop.eup %4651 }
 0xe44   : > { %v5680_v39 = vadd.f32 %v4091_v40, %v3536_v33  ;;  %v3526_v26 = vmul.f32 %v4652_v38, %v3494_v62 }
 0xe46   : > { %4406 = vmatprep.mubr.msk.f32.mxu0 %vm557_vm0, %v5680_v39  ;;  %v3537_v18 = vmul.f32 %v4090_v28, %v3526_v26 }
 0xe48   : > { %v5684_v19 = vadd.f32 %v4091_v40, %v3537_v18 }
 0xe4a   : > { %4407 = vmatmul.mubr.msk.f32.gmra.mrb[36].mxu0 %vm557_vm0, %v5684_v19 }
 0xf13   : > { %v4405_v43 = vpop.f32.mrb[34].mxu0 }
 0xf14   : > { %v3644_v48 = vadd.f32 %v4405_v43, %v4092_v42  ;;  %v3638_v45 = vpop.f32.mrb[35].mxu0 }
 0xf15   : > { %v3639_v47 = vadd.f32 %v4092_v42, %v3638_v45 }
 0xf16   : > { %v3662_v49 = vmul.f32 0.70710677, %v3644_v48  ;;  %v3658_v62 = vmul.f32 0.5, %v3644_v48 }
 0xf17   : > { %v3661_v51 = vmul.f32 0.70710677, %v3639_v47  ;;  %v3657_v60 = vmul.f32 0.5, %v3639_v47 }
 0xf18   : > { %4653 = verf.f32 %v3662_v49 }
 0xf19   : > { %4655 = verf.f32 %v3661_v51 }
 0xf1d   : > { %v4408_v52 = vpop.f32.mrb[36].mxu0 }
 0xf1e   : > { %v3654_v53 = vadd.f32 %v4408_v52, %v4092_v42  ;;  %v3648_v54 = vpop.f32.mrb[37].mxu0 }
 0xf1f   : > { %v3649_v55 = vadd.f32 %v4092_v42, %v3648_v54 }
 0xf20   : > { %v3664_v56 = vmul.f32 0.70710677, %v3654_v53  ;;  %v3660_v6 = vmul.f32 0.5, %v3654_v53 }
 0xf21   : > { %v3663_v57 = vmul.f32 0.70710677, %v3649_v55  ;;  %v3659_v4 = vmul.f32 0.5, %v3649_v55 }
 0xf22   : > { %v4654_v58 = vpop.eup %4653  ;;  %4657 = verf.f32 %v3664_v56 }
 0xf23   : > { %v4656_v10 = vpop.eup %4655  ;;  %v3670_v59 = vadd.f32 1.0, %v4654_v58  ;;  %4659 = verf.f32 %v3663_v57 }
 0xf24   : > { %v3669_v61 = vadd.f32 1.0, %v4656_v10 }
 0xf25   : > { %v3674_v0 = vmul.f32 %v3670_v59, %v3658_v62  ;;  %v4102_v59 = vld [vmem:[%s5828_s21] ss:$0 sm:$0xff]  ;;  %s5733_s21 = scalar_lea.hbm %s5830_s12, %s4110_s9 }
 0xf26   : > { %v3673_v63 = vmul.f32 %v3669_v61, %v3657_v60  ;;  %v4103_v62 = vld [vmem:[%s5829_s10] ss:$0 sm:$0xff]  ;;  %s4877_s10 = scalar_lea.vmem %s4876_s22, 1024 }
 0xf27   : > { %p4879_p0 = scmp.lt.s32.totalorder %s4877_s10, %s4871_s16 }
 0xf28   : > { %4417 = vmatprep.mubr.msk.f32.mxu1 %vm557_vm0, %v3673_v63 }
 0xf29   : > { %4418 = vmatmul.mubr.msk.f32.vlgmr.msra.gmra.mrb[38].mxu1 %vm557_vm0, %v3674_v0  ;;  %p4880_p2 = por %p4879_p0, %p4878_p13 }
 0xf2b   : > { %p4881_p8 = pnand %p4880_p2, %p4874_p1 }
 0xf2c   : > { %v4658_v1 = vpop.eup %4657 }
 0xf2d   : > { %v4660_v2 = vpop.eup %4659  ;;  %v3672_v3 = vadd.f32 1.0, %v4658_v1 }
 0xf2e   : > { %v3671_v5 = vadd.f32 1.0, %v4660_v2 }
 0xf2f   : > { %v3676_v8 = vmul.f32 %v3672_v3, %v3660_v6 }
 0xf30   : > { %v3675_v7 = vmul.f32 %v3671_v5, %v3659_v4 }
 0xf32   : > { %4420 = vmatprep.mubr.msk.f32.mxu1 %vm557_vm0, %v3675_v7 }
 0xf33   : > { %4421 = vmatmul.mubr.msk.f32.gmra.mrb[40].mxu1 %vm557_vm0, %v3676_v8 }
 0xffc   : > { %v4419_v11 = vpop.f32.mrb[38].mxu1 }
 0xffd   : > { %v3772_v12 = vadd.f32 %v4419_v11, %v4097_v9  ;;  %v3766_v13 = vpop.f32.mrb[39].mxu1 }
 0xffe   : > { %v3767_v15 = vadd.f32 %v4097_v9, %v3766_v13 }
 0xfff   : > { %v3786_v16 = vadd.f32 %v3772_v12, %v5674_v35 }
0x1000   : > { %v3785_v20 = vadd.f32 %v3767_v15, %v5672_v34 }
0x1001   : > { %v3792_v22 = vsel %vm557_vm0, %v3786_v16, 0.0 }
0x1002   : > { %3793 = vadd.xlane.f32.xlu0 %v3792_v22  ;;  %v3789_v23 = vsel %vm557_vm0, %v3785_v20, 0.0 }
0x1003   : > { %3790 = vadd.xlane.f32.xlu1 %v3789_v23 }
0x1006   : > { %v4422_v29 = vpop.f32.mrb[40].mxu1 }
0x1007   : > { %v3782_v31 = vadd.f32 %v4422_v29, %v4097_v9  ;;  %v3776_v25 = vpop.f32.mrb[41].mxu1 }
0x1008   : > { %v3777_v28 = vadd.f32 %v4097_v9, %v3776_v25 }
0x1009   : > { %v3788_v30 = vadd.f32 %v3782_v31, %v5684_v19 }
0x100a   : > { %v3787_v32 = vadd.f32 %v3777_v28, %v5680_v39 }
0x100b   : > { %v3798_v21 = vsel %vm557_vm0, %v3788_v30, 0.0 }
0x100c   : > { %3799 = vadd.xlane.f32.xlu0 %v3798_v21  ;;  %v3795_v40 = vsel %vm557_vm0, %v3787_v32, 0.0 }
0x100d   : > { %3796 = vadd.xlane.f32.xlu1 %v3795_v40 }
0x108f   : > { %v3794_v24 = vpop.xlane.xlu0 %3793 }
0x1090   : > { %v3802_v14 = vmul.f32 0.03125, %v3794_v24  ;;  %v3791_v34 = vpop.xlane.xlu1 %3790 }
0x1091   : > { %v3801_v35 = vmul.f32 0.03125, %v3791_v34 }
0x1092   : > { %v3806_v36 = vsub.f32 %v3786_v16, %v3802_v14 }
0x1093   : > { %v3805_v37 = vsub.f32 %v3785_v20, %v3801_v35 }
0x1094   : > { %v3810_v33 = vmul.f32 %v3806_v36, %v3806_v36 }
0x1095   : > { %v3809_v38 = vmul.f32 %v3805_v37, %v3805_v37 }
0x1096   : > { %v3816_v26 = vsel %vm557_vm0, %v3810_v33, 0.0 }
0x1097   : > { %3817 = vadd.xlane.f32.xlu0 %v3816_v26  ;;  %v3813_v18 = vsel %vm557_vm0, %v3809_v38, 0.0 }
0x1098   : > { %3814 = vadd.xlane.f32.xlu1 %v3813_v18 }
0x1099   : > { %v3800_v39 = vpop.xlane.xlu0 %3799 }
0x109a   : > { %v3804_v19 = vmul.f32 0.03125, %v3800_v39  ;;  %v3797_v17 = vpop.xlane.xlu1 %3796 }
0x109b   : > { %v3803_v44 = vmul.f32 0.03125, %v3797_v17 }
0x109c   : > { %v3808_v27 = vsub.f32 %v3788_v30, %v3804_v19 }
0x109d   : > { %v3807_v46 = vsub.f32 %v3787_v32, %v3803_v44 }
0x109e   : > { %v3812_v41 = vmul.f32 %v3808_v27, %v3808_v27 }
0x109f   : > { %v3811_v50 = vmul.f32 %v3807_v46, %v3807_v46 }
0x10a0   : > { %v3822_v42 = vsel %vm557_vm0, %v3812_v41, 0.0 }
0x10a1   : > { %3823 = vadd.xlane.f32.xlu0 %v3822_v42  ;;  %v3819_v43 = vsel %vm557_vm0, %v3811_v50, 0.0 }
0x10a2   : > { %3820 = vadd.xlane.f32.xlu1 %v3819_v43 }
0x1124   : > { %v3818_v48 = vpop.xlane.xlu0 %3817 }
0x1125   : > { %v3826_v45 = vmul.f32 0.03125, %v3818_v48  ;;  %v3815_v47 = vpop.xlane.xlu1 %3814 }
0x1126   : > { %v3825_v49 = vmul.f32 0.03125, %v3815_v47 }
0x1127   : > { %v3830_v51 = vadd.f32 1e-05, %v3826_v45 }
0x1128   : > { %v3829_v52 = vadd.f32 1e-05, %v3825_v49 }
0x1129   : > { %4661 = vrsqrt.f32 %v3830_v51 }
0x112a   : > { %4663 = vrsqrt.f32 %v3829_v52 }
0x112e   : > { %v3824_v53 = vpop.xlane.xlu0 %3823 }
0x112f   : > { %v3828_v54 = vmul.f32 0.03125, %v3824_v53  ;;  %v3821_v55 = vpop.xlane.xlu1 %3820 }
0x1130   : > { %v3827_v56 = vmul.f32 0.03125, %v3821_v55 }
0x1131   : > { %v3832_v57 = vadd.f32 1e-05, %v3828_v54 }
0x1132   : > { %v3831_v58 = vadd.f32 1e-05, %v3827_v56 }
0x1133   : > { %v4662_v10 = vpop.eup %4661  ;;  %4665 = vrsqrt.f32 %v3832_v57 }
0x1134   : > { %v4664_v60 = vpop.eup %4663  ;;  %v3838_v61 = vmul.f32 %v4662_v10, %v3806_v36  ;;  %4667 = vrsqrt.f32 %v3831_v58 }
0x1135   : > { %v3837_v63 = vmul.f32 %v4664_v60, %v3805_v37 }
0x1136   : > { %v3849_v0 = vmul.f32 %v4102_v59, %v3838_v61 }
0x1137   : > { %v3848_v1 = vmul.f32 %v4102_v59, %v3837_v63 }
0x1138   : > { %v3860_v2 = vadd.f32 %v4103_v62, %v3849_v0 }
0x1139   : > { %v3859_v3 = vadd.f32 %v4103_v62, %v3848_v1 }
0x113a   : > { %3864 = vst.msk [vmem:[%s539_s1 + $0x8] sm:$0xff] %vm557_vm0, %v3860_v2 }
0x113b   : > { %3863 = vst.msk [vmem:[%s539_s1] sm:$0xff] %vm557_vm0, %v3859_v3 }
0x113d   : > { %v4666_v4 = vpop.eup %4665 }
0x113e   : > { %v4668_v5 = vpop.eup %4667  ;;  %v3840_v6 = vmul.f32 %v4666_v4, %v3808_v27 }
0x113f   : > { %v3839_v7 = vmul.f32 %v4668_v5, %v3807_v46 }
0x1140   : > { %v3851_v8 = vmul.f32 %v4102_v59, %v3840_v6 }
0x1141   : > { %v3850_v9 = vmul.f32 %v4102_v59, %v3839_v7 }
0x1142   : > { %v3862_v11 = vadd.f32 %v4103_v62, %v3851_v8 }
0x1143   : > { %v3861_v12 = vadd.f32 %v4103_v62, %v3850_v9 }
0x1144   : > { %3866 = vst.msk [vmem:[%s539_s1 + $0x18] sm:$0xff] %vm557_vm0, %v3862_v11 }
0x1145   : > { %3865 = vst.msk [vmem:[%s539_s1 + $0x10] sm:$0xff] %vm557_vm0, %v3861_v12 }
0x1146   : > { %4884 = shalt.err (!%p4881_p8)
}
0x1147   : > { %s4885_s1 = scalar_lea.hbm %s5733_s21, 512  ;;  %s4889_s24 = scalar_lea.hbm %s5830_s12, 1024 }
0x1148   : > { %p4886_p4 = scmp.ne.s32.totalorder %s5733_s21, %s4885_s1  ;;  %p4890_p3 = scmp.lt.u32.totalorder %s5733_s21, %s5830_s12 }
0x1149   : > { %p4891_p5 = scmp.lt.u32.totalorder %s4889_s24, %s4885_s1  ;;  %p4893_p6 = scmp.lt.u32.totalorder %s4885_s1, %s5733_s21 }
0x114a   : > { %p4887_p10 = pnand %p4886_p4, %p5831_p9 }
0x114b   : > { %p4892_p7 = por %p4891_p5, %p4890_p3 }
0x114c   : > { %p4888_p11 = pneg %p4887_p10 }
0x114d   : > { %p4894_p12 = por %p4893_p6, %p4892_p7 }
0x114f   : > { %p4895_p1 = pnand %p4894_p12, %p4888_p11 }
0x1151   : > { %4898 = shalt.err (!%p4895_p1)
}
0x1152   : > { %s4977_s16 = smov 128  }
0x1153   : > { %4481 = dma.vmem_to_hbm [thread:$0]  (%p5831_p9), %s5735_s11, 512, %s5733_s21, %s3868_s14, %s4977_s16, %s4977_s16, %s4973_s13  }
0x1154 PF: > { %s3896_s10 = sand.u32 1, %s4937_s25   ;;  %p5832_p13 = scmp.ne.s32.totalorder %s5816_s17, 0 }
0x1155   : > { %p5833_p0 = scmp.ge.s32.totalorder %s4949_s28, 2  ;;  %s3897_s1 = scalar_lea.sflag [#allocation4], %s3896_s10 }
0x1157   : > { %p4507_p2 = pnand %p5833_p0, %p5832_p13 }
0x1159   : > { %4932 = dma.done.wait (!%p4507_p2), %s3897_s1, 512  }
0x115a   : > { %4934 = vsyncadd (!%p4507_p2), %s3897_s1, 4294966784  ;;  %p29_p8 = scmp.ge.s32.totalorder %s5234_s18, 4   ;;  %s5834_s25 = smov %s4941_s26 }
0x115b   : > { %s5835_s26 = smov %s4945_s27  ;;  %s5836_s27 = smov %s5245_s29 }
0x115c   : > { %s5837_s28 = smov %s5234_s18  ;;  %31 = sbr.rel (!%p29_p8) target bundleno = 15 (0xf), region = 141 }
0x1163   :  { %3902 = vsyncpa [#allocation3], 1 }
0x1164   :  { %3904 = vsyncpa [#allocation3 + $0x1], 1 }
0x1165   :  { %3905 = vsyncpa [#allocation6], 1 }
0x1166   :  { %3906 = vsyncpa [#allocation9], 1 }
0x1167   :  { %3907 = vsyncpa [#allocation12], 1 }
0x1168   :  { %3908 = vsyncpa [#allocation4], 1 }
0x1169   :  { %3910 = vsyncpa [#allocation4 + $0x1], 1 }

</bundles_post_ra>
